<compile_context>
chip_gen: v5e
topology: v5e:2x2
jax: 0.10.0
libtpu: 0.0.40
codegen_flags: <defaults>
</compile_context>

<pallas_src>
import functools

import jax
import jax.numpy as jnp
from jax import lax
from jax.experimental import pallas as pl
from jax.experimental.pallas import tpu as pltpu


# ----------------------------- Pallas kernel ---------------------------------


def _space_to_depth_kernel(x_ref, o_ref, *, k, t, wo, bc):
    """x_ref block: (bc, t*k, W) rows = oh*k+kh ; o_ref block: (bc, k*k, t*wo) lane-dense."""
    for b in range(bc):                        # static unroll, bc <= 8 per block
        xb = x_ref[b]                          # (t*k, W)   [oh*k+kh, ow*k+kw]
        z = xb.T                               # (W, t*k)   [ow*k+kw, oh*k+kh]  (2-D transpose)
        z3 = z.reshape(wo, k, t * k)           # [ow, kw, oh*k+kh]  (sublane split)
        planes = [[None] * k for _ in range(k)]
        for kw in range(k):                    # static unroll (k == 8 for Net)
            zk = z3[:, kw, :]                  # (wo, t*k)  [ow, oh*k+kh]
            zt = zk.T                          # (t*k, wo)  [oh*k+kh, ow]       (2-D transpose)
            z4 = zt.reshape(t, k, wo)          # [oh, kh, ow]  (sublane split)
            for kh in range(k):
                planes[kh][kw] = z4[:, kh, :]  # (t, wo)    [oh, ow]
        # Assemble the whole (k*k, t*wo) output slab in registers, then ONE bulk store.
        groups = [jnp.stack([planes[kh][kw] for kw in range(k)], axis=0)   # (k, t, wo)
                  for kh in range(k)]
        slab3 = jnp.concatenate(groups, axis=0)                            # (k*k, t, wo)
        slab = jnp.concatenate([slab3[:, oh, :] for oh in range(t)], axis=1)  # (k*k, t*wo)
        o_ref[b] = slab                        # single lane-dense store per image


def _slab_target_bytes():
    """Per-buffer slab budget, generation-aware: double-buffered in+out must stay well
    inside the default scoped-VMEM limit on every generation."""
    try:
        vmem = pltpu.get_tpu_info().vmem_capacity_bytes
    except Exception:                      # interpret mode / older runtime: be conservative
        vmem = 64 * 1024 * 1024
    # v5e/v6e: 128 MiB VMEM -> 4 MiB slabs; v7x: 64 MiB -> 2 MiB slabs.
    return (4 if vmem >= (100 << 20) else 2) * 1024 * 1024


def _choose_tiles(bc, ho, wo, k, w, itemsize, target_bytes):
    """Pick (output-row tile t, batch*channel tile bc_blk).

    Output block last dims are (k*k, t*wo): t must be the full Ho or give a 128-multiple
    lane width.  Input block last dims are (t*k, W): t*k must be a multiple of 8 (or full)."""
    per_row_bytes = k * w * itemsize
    legal = [t for t in range(1, ho + 1)
             if ho % t == 0
             and (t == ho or ((t * wo) % 128 == 0 and (t * k) % 8 == 0))]
    fitting = [t for t in legal if t * per_row_bytes <= target_bytes]
    t = max(fitting) if fitting else min(legal)
    # TODO(synk): pad/mask Ho instead of falling back to a full-extent slab when a huge
    # image has no budget-fitting legal tile.
    slab_bytes = t * per_row_bytes
    bc_divs = [d for d in range(1, bc + 1) if bc % d == 0 and d <= 8]  # cap unroll at 8
    fit_bc = [d for d in bc_divs if d * slab_bytes <= target_bytes]
    bc_blk = max(fit_bc) if fit_bc else 1
    return t, bc_blk


@functools.partial(jax.jit, static_argnames=("out_ch", "kernel"))
def pixelshuffle_down(x, *, out_ch, kernel):
    """x: (B, in_ch, H, W) NCHW float; returns (B, out_ch, H//k, W//k) NCHW."""
    B, C, H, W = x.shape
    k = kernel
    assert H % k == 0 and W % k == 0, "H and W must be multiples of the kernel size"
    assert out_ch <= C * k * k
    Ho, Wo = H // k, W // k
    itemsize = jnp.dtype(x.dtype).itemsize
    t, bc_blk = _choose_tiles(B * C, Ho, Wo, k, W, itemsize, _slab_target_bytes())

    x2 = x.reshape(B * C, H, W)                 # free: merges leading dims only

    out = pl.pallas_call(
        functools.partial(_space_to_depth_kernel, k=k, t=t, wo=Wo, bc=bc_blk),
        out_shape=jax.ShapeDtypeStruct((B * C, k * k, Ho * Wo), x.dtype),
        grid_spec=pltpu.PrefetchScalarGridSpec(
            num_scalar_prefetch=0,
            grid=((B * C) // bc_blk, Ho // t),  # (1, 1) for Net's actual shapes
            in_specs=[pl.BlockSpec((bc_blk, t * k, W), lambda i, j: (i, j, 0))],
            out_specs=pl.BlockSpec((bc_blk, k * k, t * Wo), lambda i, j: (i, 0, j)),
        ),
        compiler_params=pltpu.CompilerParams(
            dimension_semantics=("parallel", "parallel"),
            # no vmem_limit_bytes override: slabs are <= ~4 MiB, well inside the default
            # scoped-VMEM limit on v5e / v6e / v7x.
        ),
        cost_estimate=pl.CostEstimate(
            flops=0,
            transcendentals=0,
            bytes_accessed=2 * B * C * H * W * itemsize,   # pure HBM read + write
        ),
    )(x2)

    out = out.reshape(B, C * k * k, Ho, Wo)     # free: contiguous split/merge only
    if out_ch < C * k * k:
        out = out[:, :out_ch]                   # identity-selection keeps first out_ch rows
    return out


def make_pixelshuffle_down_weight(out_ch, in_ch, kernel, dtype=jnp.float32):
    """The fixed weight from the PyTorch __init__ (identity-selection rows), for reference."""
    k2 = in_ch * kernel * kernel
    flat = jnp.zeros((out_ch, k2), dtype=dtype)
    idx = jnp.arange(out_ch)
    flat = flat.at[idx, idx].set(1.0)
    return flat.reshape(out_ch, in_ch, kernel, kernel)


# ------------------------- rest of Net.forward (XLA ops) ----------------------


def _conv3x3(x, w):
    return lax.conv_general_dilated(
        x, w, window_strides=(1, 1), padding=((1, 1), (1, 1)),
        dimension_numbers=("NCHW", "OIHW", "NCHW"))


def _bn_relu(x, eps=1e-5):
    # BatchNorm2d with freshly-initialized parameters in eval mode:
    # gamma=1, beta=0, running_mean=0, running_var=1  ->  x / sqrt(1 + eps), then ReLU.
    # TODO(synk): with trained gamma/beta/running stats this needs the full affine BN.
    return jnp.maximum(x * (1.0 / jnp.sqrt(1.0 + eps)), 0.0)


def _maxpool2(x):
    return lax.reduce_window(x, -jnp.inf, lax.max, (1, 1, 2, 2), (1, 1, 2, 2), "VALID")


@jax.jit
def net_forward(x, params):
    y = pixelshuffle_down(x, out_ch=64, kernel=8)          # Pallas kernel
    y = _bn_relu(_conv3x3(y, params["conv1"]))
    y = _bn_relu(_conv3x3(y, params["conv2"]))
    y = _maxpool2(y)
    y = _bn_relu(_conv3x3(y, params["conv3"]))
    y = _bn_relu(_conv3x3(y, params["conv4"]))
    y = _maxpool2(y)
    y = _bn_relu(_conv3x3(y, params["conv5"]))
    y = _bn_relu(_conv3x3(y, params["conv6"]))
    y = jnp.mean(y, axis=(2, 3))                           # adaptive avg pool -> (B, 256)
    y = y @ params["fc"].T                                 # (B, 2), no bias
    return y                                               # dropout unused in forward


# ----------------------------------- main -------------------------------------


if __name__ == "__main__":
    key = jax.random.PRNGKey(0)
    B, in_ch, H, W = 2, 1, 32, 32          # Net: PixelShuffle_down(64, 1, 8)
    out_ch, k = 64, 8

    kx, k1, k2, k3, k4, k5, k6, kf = jax.random.split(key, 8)
    x = jax.random.normal(kx, (B, in_ch, H, W), dtype=jnp.float32)

    # --- Pallas kernel: PixelShuffle_down (the custom op in Net) ---
    down = pixelshuffle_down(x, out_ch=out_ch, kernel=k)
    down = jax.block_until_ready(down)

    w_ref = make_pixelshuffle_down_weight(out_ch, in_ch, k)
    ref = lax.conv_general_dilated(
        x, w_ref, window_strides=(k, k), padding="VALID",
        dimension_numbers=("NCHW", "OIHW", "NCHW"))
    assert down.shape == ref.shape == (B, out_ch, H // k, W // k)
    assert jnp.allclose(down, ref, atol=1e-6, rtol=1e-6)

    # --- Full Net forward (remaining layers on XLA native ops) ---
    params = {
        "conv1": 0.05 * jax.random.normal(k1, (256, 64, 3, 3), jnp.float32),
        "conv2": 0.05 * jax.random.normal(k2, (256, 256, 3, 3), jnp.float32),
        "conv3": 0.05 * jax.random.normal(k3, (256, 256, 3, 3), jnp.float32),
        "conv4": 0.05 * jax.random.normal(k4, (256, 256, 3, 3), jnp.float32),
        "conv5": 0.05 * jax.random.normal(k5, (256, 256, 3, 3), jnp.float32),
        "conv6": 0.05 * jax.random.normal(k6, (256, 256, 3, 3), jnp.float32),
        "fc": 0.05 * jax.random.normal(kf, (2, 256), jnp.float32),
    }
    logits = net_forward(x, params)
    logits = jax.block_until_ready(logits)
    assert logits.shape == (B, 2)
    assert bool(jnp.all(jnp.isfinite(logits)))

    print("KERNEL_OK")
</pallas_src>

<mosaic_0001>
module attributes {stable_mosaic.version = 11 : i64} {
  func.func @_space_to_depth_kernel(%arg0: i32, %arg1: i32, %arg2: memref<2x32x32xf32, #tpu.memory_space<vmem>>, %arg3: memref<2x64x16xf32, #tpu.memory_space<vmem>>) attributes {dimension_semantics = [#tpu.dimension_semantics<parallel>, #tpu.dimension_semantics<parallel>], iteration_bounds = array<i64: 1, 1>, scalar_prefetch = 0 : i64, scratch_operands = 0 : i64, tpu.core_type = #tpu.core_type<tc>, window_params = [{transform_indices = @transform_0, window_bounds = array<i64: 2, 32, 32>}, {transform_indices = @transform_1, window_bounds = array<i64: 2, 64, 16>}]} {
    %c0 = arith.constant 0 : index
    %c0_0 = arith.constant 0 : index
    %c0_1 = arith.constant 0 : index
    %0 = vector.load %arg2[%c0, %c0_0, %c0_1] : memref<2x32x32xf32, #tpu.memory_space<vmem>>, vector<1x32x32xf32>
    %1 = vector.shape_cast %0 : vector<1x32x32xf32> to vector<32x32xf32>
    %2 = tpu.transpose %1, [1, 0] : vector<32x32xf32> -> vector<32x32xf32>
    %3 = vector.shape_cast %2 : vector<32x32xf32> to vector<4x8x32xf32>
    %4 = vector.extract_strided_slice %3 {offsets = [0, 0, 0], sizes = [4, 1, 32], strides = [1, 1, 1]} : vector<4x8x32xf32> to vector<4x1x32xf32>
    %5 = vector.shape_cast %4 : vector<4x1x32xf32> to vector<4x32xf32>
    %6 = tpu.transpose %5, [1, 0] : vector<4x32xf32> -> vector<32x4xf32>
    %7 = vector.shape_cast %6 : vector<32x4xf32> to vector<4x8x4xf32>
    %8 = vector.extract_strided_slice %7 {offsets = [0, 0, 0], sizes = [4, 1, 4], strides = [1, 1, 1]} : vector<4x8x4xf32> to vector<4x1x4xf32>
    %9 = vector.shape_cast %8 : vector<4x1x4xf32> to vector<4x4xf32>
    %10 = vector.extract_strided_slice %7 {offsets = [0, 1, 0], sizes = [4, 1, 4], strides = [1, 1, 1]} : vector<4x8x4xf32> to vector<4x1x4xf32>
    %11 = vector.shape_cast %10 : vector<4x1x4xf32> to vector<4x4xf32>
    %12 = vector.extract_strided_slice %7 {offsets = [0, 2, 0], sizes = [4, 1, 4], strides = [1, 1, 1]} : vector<4x8x4xf32> to vector<4x1x4xf32>
    %13 = vector.shape_cast %12 : vector<4x1x4xf32> to vector<4x4xf32>
    %14 = vector.extract_strided_slice %7 {offsets = [0, 3, 0], sizes = [4, 1, 4], strides = [1, 1, 1]} : vector<4x8x4xf32> to vector<4x1x4xf32>
    %15 = vector.shape_cast %14 : vector<4x1x4xf32> to vector<4x4xf32>
    %16 = vector.extract_strided_slice %7 {offsets = [0, 4, 0], sizes = [4, 1, 4], strides = [1, 1, 1]} : vector<4x8x4xf32> to vector<4x1x4xf32>
    %17 = vector.shape_cast %16 : vector<4x1x4xf32> to vector<4x4xf32>
    %18 = vector.extract_strided_slice %7 {offsets = [0, 5, 0], sizes = [4, 1, 4], strides = [1, 1, 1]} : vector<4x8x4xf32> to vector<4x1x4xf32>
    %19 = vector.shape_cast %18 : vector<4x1x4xf32> to vector<4x4xf32>
    %20 = vector.extract_strided_slice %7 {offsets = [0, 6, 0], sizes = [4, 1, 4], strides = [1, 1, 1]} : vector<4x8x4xf32> to vector<4x1x4xf32>
    %21 = vector.shape_cast %20 : vector<4x1x4xf32> to vector<4x4xf32>
    %22 = vector.extract_strided_slice %7 {offsets = [0, 7, 0], sizes = [4, 1, 4], strides = [1, 1, 1]} : vector<4x8x4xf32> to vector<4x1x4xf32>
    %23 = vector.shape_cast %22 : vector<4x1x4xf32> to vector<4x4xf32>
    %24 = vector.extract_strided_slice %3 {offsets = [0, 1, 0], sizes = [4, 1, 32], strides = [1, 1, 1]} : vector<4x8x32xf32> to vector<4x1x32xf32>
    %25 = vector.shape_cast %24 : vector<4x1x32xf32> to vector<4x32xf32>
    %26 = tpu.transpose %25, [1, 0] : vector<4x32xf32> -> vector<32x4xf32>
    %27 = vector.shape_cast %26 : vector<32x4xf32> to vector<4x8x4xf32>
    %28 = vector.extract_strided_slice %27 {offsets = [0, 0, 0], sizes = [4, 1, 4], strides = [1, 1, 1]} : vector<4x8x4xf32> to vector<4x1x4xf32>
    %29 = vector.shape_cast %28 : vector<4x1x4xf32> to vector<4x4xf32>
    %30 = vector.extract_strided_slice %27 {offsets = [0, 1, 0], sizes = [4, 1, 4], strides = [1, 1, 1]} : vector<4x8x4xf32> to vector<4x1x4xf32>
    %31 = vector.shape_cast %30 : vector<4x1x4xf32> to vector<4x4xf32>
    %32 = vector.extract_strided_slice %27 {offsets = [0, 2, 0], sizes = [4, 1, 4], strides = [1, 1, 1]} : vector<4x8x4xf32> to vector<4x1x4xf32>
    %33 = vector.shape_cast %32 : vector<4x1x4xf32> to vector<4x4xf32>
    %34 = vector.extract_strided_slice %27 {offsets = [0, 3, 0], sizes = [4, 1, 4], strides = [1, 1, 1]} : vector<4x8x4xf32> to vector<4x1x4xf32>
    %35 = vector.shape_cast %34 : vector<4x1x4xf32> to vector<4x4xf32>
    %36 = vector.extract_strided_slice %27 {offsets = [0, 4, 0], sizes = [4, 1, 4], strides = [1, 1, 1]} : vector<4x8x4xf32> to vector<4x1x4xf32>
    %37 = vector.shape_cast %36 : vector<4x1x4xf32> to vector<4x4xf32>
    %38 = vector.extract_strided_slice %27 {offsets = [0, 5, 0], sizes = [4, 1, 4], strides = [1, 1, 1]} : vector<4x8x4xf32> to vector<4x1x4xf32>
    %39 = vector.shape_cast %38 : vector<4x1x4xf32> to vector<4x4xf32>
    %40 = vector.extract_strided_slice %27 {offsets = [0, 6, 0], sizes = [4, 1, 4], strides = [1, 1, 1]} : vector<4x8x4xf32> to vector<4x1x4xf32>
    %41 = vector.shape_cast %40 : vector<4x1x4xf32> to vector<4x4xf32>
    %42 = vector.extract_strided_slice %27 {offsets = [0, 7, 0], sizes = [4, 1, 4], strides = [1, 1, 1]} : vector<4x8x4xf32> to vector<4x1x4xf32>
    %43 = vector.shape_cast %42 : vector<4x1x4xf32> to vector<4x4xf32>
    %44 = vector.extract_strided_slice %3 {offsets = [0, 2, 0], sizes = [4, 1, 32], strides = [1, 1, 1]} : vector<4x8x32xf32> to vector<4x1x32xf32>
    %45 = vector.shape_cast %44 : vector<4x1x32xf32> to vector<4x32xf32>
    %46 = tpu.transpose %45, [1, 0] : vector<4x32xf32> -> vector<32x4xf32>
    %47 = vector.shape_cast %46 : vector<32x4xf32> to vector<4x8x4xf32>
    %48 = vector.extract_strided_slice %47 {offsets = [0, 0, 0], sizes = [4, 1, 4], strides = [1, 1, 1]} : vector<4x8x4xf32> to vector<4x1x4xf32>
    %49 = vector.shape_cast %48 : vector<4x1x4xf32> to vector<4x4xf32>
    %50 = vector.extract_strided_slice %47 {offsets = [0, 1, 0], sizes = [4, 1, 4], strides = [1, 1, 1]} : vector<4x8x4xf32> to vector<4x1x4xf32>
    %51 = vector.shape_cast %50 : vector<4x1x4xf32> to vector<4x4xf32>
    %52 = vector.extract_strided_slice %47 {offsets = [0, 2, 0], sizes = [4, 1, 4], strides = [1, 1, 1]} : vector<4x8x4xf32> to vector<4x1x4xf32>
    %53 = vector.shape_cast %52 : vector<4x1x4xf32> to vector<4x4xf32>
    %54 = vector.extract_strided_slice %47 {offsets = [0, 3, 0], sizes = [4, 1, 4], strides = [1, 1, 1]} : vector<4x8x4xf32> to vector<4x1x4xf32>
    %55 = vector.shape_cast %54 : vector<4x1x4xf32> to vector<4x4xf32>
    %56 = vector.extract_strided_slice %47 {offsets = [0, 4, 0], sizes = [4, 1, 4], strides = [1, 1, 1]} : vector<4x8x4xf32> to vector<4x1x4xf32>
    %57 = vector.shape_cast %56 : vector<4x1x4xf32> to vector<4x4xf32>
    %58 = vector.extract_strided_slice %47 {offsets = [0, 5, 0], sizes = [4, 1, 4], strides = [1, 1, 1]} : vector<4x8x4xf32> to vector<4x1x4xf32>
    %59 = vector.shape_cast %58 : vector<4x1x4xf32> to vector<4x4xf32>
    %60 = vector.extract_strided_slice %47 {offsets = [0, 6, 0], sizes = [4, 1, 4], strides = [1, 1, 1]} : vector<4x8x4xf32> to vector<4x1x4xf32>
    %61 = vector.shape_cast %60 : vector<4x1x4xf32> to vector<4x4xf32>
    %62 = vector.extract_strided_slice %47 {offsets = [0, 7, 0], sizes = [4, 1, 4], strides = [1, 1, 1]} : vector<4x8x4xf32> to vector<4x1x4xf32>
    %63 = vector.shape_cast %62 : vector<4x1x4xf32> to vector<4x4xf32>
    %64 = vector.extract_strided_slice %3 {offsets = [0, 3, 0], sizes = [4, 1, 32], strides = [1, 1, 1]} : vector<4x8x32xf32> to vector<4x1x32xf32>
    %65 = vector.shape_cast %64 : vector<4x1x32xf32> to vector<4x32xf32>
    %66 = tpu.transpose %65, [1, 0] : vector<4x32xf32> -> vector<32x4xf32>
    %67 = vector.shape_cast %66 : vector<32x4xf32> to vector<4x8x4xf32>
    %68 = vector.extract_strided_slice %67 {offsets = [0, 0, 0], sizes = [4, 1, 4], strides = [1, 1, 1]} : vector<4x8x4xf32> to vector<4x1x4xf32>
    %69 = vector.shape_cast %68 : vector<4x1x4xf32> to vector<4x4xf32>
    %70 = vector.extract_strided_slice %67 {offsets = [0, 1, 0], sizes = [4, 1, 4], strides = [1, 1, 1]} : vector<4x8x4xf32> to vector<4x1x4xf32>
    %71 = vector.shape_cast %70 : vector<4x1x4xf32> to vector<4x4xf32>
    %72 = vector.extract_strided_slice %67 {offsets = [0, 2, 0], sizes = [4, 1, 4], strides = [1, 1, 1]} : vector<4x8x4xf32> to vector<4x1x4xf32>
    %73 = vector.shape_cast %72 : vector<4x1x4xf32> to vector<4x4xf32>
    %74 = vector.extract_strided_slice %67 {offsets = [0, 3, 0], sizes = [4, 1, 4], strides = [1, 1, 1]} : vector<4x8x4xf32> to vector<4x1x4xf32>
    %75 = vector.shape_cast %74 : vector<4x1x4xf32> to vector<4x4xf32>
    %76 = vector.extract_strided_slice %67 {offsets = [0, 4, 0], sizes = [4, 1, 4], strides = [1, 1, 1]} : vector<4x8x4xf32> to vector<4x1x4xf32>
    %77 = vector.shape_cast %76 : vector<4x1x4xf32> to vector<4x4xf32>
    %78 = vector.extract_strided_slice %67 {offsets = [0, 5, 0], sizes = [4, 1, 4], strides = [1, 1, 1]} : vector<4x8x4xf32> to vector<4x1x4xf32>
    %79 = vector.shape_cast %78 : vector<4x1x4xf32> to vector<4x4xf32>
    %80 = vector.extract_strided_slice %67 {offsets = [0, 6, 0], sizes = [4, 1, 4], strides = [1, 1, 1]} : vector<4x8x4xf32> to vector<4x1x4xf32>
    %81 = vector.shape_cast %80 : vector<4x1x4xf32> to vector<4x4xf32>
    %82 = vector.extract_strided_slice %67 {offsets = [0, 7, 0], sizes = [4, 1, 4], strides = [1, 1, 1]} : vector<4x8x4xf32> to vector<4x1x4xf32>
    %83 = vector.shape_cast %82 : vector<4x1x4xf32> to vector<4x4xf32>
    %84 = vector.extract_strided_slice %3 {offsets = [0, 4, 0], sizes = [4, 1, 32], strides = [1, 1, 1]} : vector<4x8x32xf32> to vector<4x1x32xf32>
    %85 = vector.shape_cast %84 : vector<4x1x32xf32> to vector<4x32xf32>
    %86 = tpu.transpose %85, [1, 0] : vector<4x32xf32> -> vector<32x4xf32>
    %87 = vector.shape_cast %86 : vector<32x4xf32> to vector<4x8x4xf32>
    %88 = vector.extract_strided_slice %87 {offsets = [0, 0, 0], sizes = [4, 1, 4], strides = [1, 1, 1]} : vector<4x8x4xf32> to vector<4x1x4xf32>
    %89 = vector.shape_cast %88 : vector<4x1x4xf32> to vector<4x4xf32>
    %90 = vector.extract_strided_slice %87 {offsets = [0, 1, 0], sizes = [4, 1, 4], strides = [1, 1, 1]} : vector<4x8x4xf32> to vector<4x1x4xf32>
    %91 = vector.shape_cast %90 : vector<4x1x4xf32> to vector<4x4xf32>
    %92 = vector.extract_strided_slice %87 {offsets = [0, 2, 0], sizes = [4, 1, 4], strides = [1, 1, 1]} : vector<4x8x4xf32> to vector<4x1x4xf32>
    %93 = vector.shape_cast %92 : vector<4x1x4xf32> to vector<4x4xf32>
    %94 = vector.extract_strided_slice %87 {offsets = [0, 3, 0], sizes = [4, 1, 4], strides = [1, 1, 1]} : vector<4x8x4xf32> to vector<4x1x4xf32>
    %95 = vector.shape_cast %94 : vector<4x1x4xf32> to vector<4x4xf32>
    %96 = vector.extract_strided_slice %87 {offsets = [0, 4, 0], sizes = [4, 1, 4], strides = [1, 1, 1]} : vector<4x8x4xf32> to vector<4x1x4xf32>
    %97 = vector.shape_cast %96 : vector<4x1x4xf32> to vector<4x4xf32>
    %98 = vector.extract_strided_slice %87 {offsets = [0, 5, 0], sizes = [4, 1, 4], strides = [1, 1, 1]} : vector<4x8x4xf32> to vector<4x1x4xf32>
    %99 = vector.shape_cast %98 : vector<4x1x4xf32> to vector<4x4xf32>
    %100 = vector.extract_strided_slice %87 {offsets = [0, 6, 0], sizes = [4, 1, 4], strides = [1, 1, 1]} : vector<4x8x4xf32> to vector<4x1x4xf32>
    %101 = vector.shape_cast %100 : vector<4x1x4xf32> to vector<4x4xf32>
    %102 = vector.extract_strided_slice %87 {offsets = [0, 7, 0], sizes = [4, 1, 4], strides = [1, 1, 1]} : vector<4x8x4xf32> to vector<4x1x4xf32>
    %103 = vector.shape_cast %102 : vector<4x1x4xf32> to vector<4x4xf32>
    %104 = vector.extract_strided_slice %3 {offsets = [0, 5, 0], sizes = [4, 1, 32], strides = [1, 1, 1]} : vector<4x8x32xf32> to vector<4x1x32xf32>
    %105 = vector.shape_cast %104 : vector<4x1x32xf32> to vector<4x32xf32>
    %106 = tpu.transpose %105, [1, 0] : vector<4x32xf32> -> vector<32x4xf32>
    %107 = vector.shape_cast %106 : vector<32x4xf32> to vector<4x8x4xf32>
    %108 = vector.extract_strided_slice %107 {offsets = [0, 0, 0], sizes = [4, 1, 4], strides = [1, 1, 1]} : vector<4x8x4xf32> to vector<4x1x4xf32>
    %109 = vector.shape_cast %108 : vector<4x1x4xf32> to vector<4x4xf32>
    %110 = vector.extract_strided_slice %107 {offsets = [0, 1, 0], sizes = [4, 1, 4], strides = [1, 1, 1]} : vector<4x8x4xf32> to vector<4x1x4xf32>
    %111 = vector.shape_cast %110 : vector<4x1x4xf32> to vector<4x4xf32>
    %112 = vector.extract_strided_slice %107 {offsets = [0, 2, 0], sizes = [4, 1, 4], strides = [1, 1, 1]} : vector<4x8x4xf32> to vector<4x1x4xf32>
    %113 = vector.shape_cast %112 : vector<4x1x4xf32> to vector<4x4xf32>
    %114 = vector.extract_strided_slice %107 {offsets = [0, 3, 0], sizes = [4, 1, 4], strides = [1, 1, 1]} : vector<4x8x4xf32> to vector<4x1x4xf32>
    %115 = vector.shape_cast %114 : vector<4x1x4xf32> to vector<4x4xf32>
    %116 = vector.extract_strided_slice %107 {offsets = [0, 4, 0], sizes = [4, 1, 4], strides = [1, 1, 1]} : vector<4x8x4xf32> to vector<4x1x4xf32>
    %117 = vector.shape_cast %116 : vector<4x1x4xf32> to vector<4x4xf32>
    %118 = vector.extract_strided_slice %107 {offsets = [0, 5, 0], sizes = [4, 1, 4], strides = [1, 1, 1]} : vector<4x8x4xf32> to vector<4x1x4xf32>
    %119 = vector.shape_cast %118 : vector<4x1x4xf32> to vector<4x4xf32>
    %120 = vector.extract_strided_slice %107 {offsets = [0, 6, 0], sizes = [4, 1, 4], strides = [1, 1, 1]} : vector<4x8x4xf32> to vector<4x1x4xf32>
    %121 = vector.shape_cast %120 : vector<4x1x4xf32> to vector<4x4xf32>
    %122 = vector.extract_strided_slice %107 {offsets = [0, 7, 0], sizes = [4, 1, 4], strides = [1, 1, 1]} : vector<4x8x4xf32> to vector<4x1x4xf32>
    %123 = vector.shape_cast %122 : vector<4x1x4xf32> to vector<4x4xf32>
    %124 = vector.extract_strided_slice %3 {offsets = [0, 6, 0], sizes = [4, 1, 32], strides = [1, 1, 1]} : vector<4x8x32xf32> to vector<4x1x32xf32>
    %125 = vector.shape_cast %124 : vector<4x1x32xf32> to vector<4x32xf32>
    %126 = tpu.transpose %125, [1, 0] : vector<4x32xf32> -> vector<32x4xf32>
    %127 = vector.shape_cast %126 : vector<32x4xf32> to vector<4x8x4xf32>
    %128 = vector.extract_strided_slice %127 {offsets = [0, 0, 0], sizes = [4, 1, 4], strides = [1, 1, 1]} : vector<4x8x4xf32> to vector<4x1x4xf32>
    %129 = vector.shape_cast %128 : vector<4x1x4xf32> to vector<4x4xf32>
    %130 = vector.extract_strided_slice %127 {offsets = [0, 1, 0], sizes = [4, 1, 4], strides = [1, 1, 1]} : vector<4x8x4xf32> to vector<4x1x4xf32>
    %131 = vector.shape_cast %130 : vector<4x1x4xf32> to vector<4x4xf32>
    %132 = vector.extract_strided_slice %127 {offsets = [0, 2, 0], sizes = [4, 1, 4], strides = [1, 1, 1]} : vector<4x8x4xf32> to vector<4x1x4xf32>
    %133 = vector.shape_cast %132 : vector<4x1x4xf32> to vector<4x4xf32>
    %134 = vector.extract_strided_slice %127 {offsets = [0, 3, 0], sizes = [4, 1, 4], strides = [1, 1, 1]} : vector<4x8x4xf32> to vector<4x1x4xf32>
    %135 = vector.shape_cast %134 : vector<4x1x4xf32> to vector<4x4xf32>
    %136 = vector.extract_strided_slice %127 {offsets = [0, 4, 0], sizes = [4, 1, 4], strides = [1, 1, 1]} : vector<4x8x4xf32> to vector<4x1x4xf32>
    %137 = vector.shape_cast %136 : vector<4x1x4xf32> to vector<4x4xf32>
    %138 = vector.extract_strided_slice %127 {offsets = [0, 5, 0], sizes = [4, 1, 4], strides = [1, 1, 1]} : vector<4x8x4xf32> to vector<4x1x4xf32>
    %139 = vector.shape_cast %138 : vector<4x1x4xf32> to vector<4x4xf32>
    %140 = vector.extract_strided_slice %127 {offsets = [0, 6, 0], sizes = [4, 1, 4], strides = [1, 1, 1]} : vector<4x8x4xf32> to vector<4x1x4xf32>
    %141 = vector.shape_cast %140 : vector<4x1x4xf32> to vector<4x4xf32>
    %142 = vector.extract_strided_slice %127 {offsets = [0, 7, 0], sizes = [4, 1, 4], strides = [1, 1, 1]} : vector<4x8x4xf32> to vector<4x1x4xf32>
    %143 = vector.shape_cast %142 : vector<4x1x4xf32> to vector<4x4xf32>
    %144 = vector.extract_strided_slice %3 {offsets = [0, 7, 0], sizes = [4, 1, 32], strides = [1, 1, 1]} : vector<4x8x32xf32> to vector<4x1x32xf32>
    %145 = vector.shape_cast %144 : vector<4x1x32xf32> to vector<4x32xf32>
    %146 = tpu.transpose %145, [1, 0] : vector<4x32xf32> -> vector<32x4xf32>
    %147 = vector.shape_cast %146 : vector<32x4xf32> to vector<4x8x4xf32>
    %148 = vector.extract_strided_slice %147 {offsets = [0, 0, 0], sizes = [4, 1, 4], strides = [1, 1, 1]} : vector<4x8x4xf32> to vector<4x1x4xf32>
    %149 = vector.shape_cast %148 : vector<4x1x4xf32> to vector<4x4xf32>
    %150 = vector.extract_strided_slice %147 {offsets = [0, 1, 0], sizes = [4, 1, 4], strides = [1, 1, 1]} : vector<4x8x4xf32> to vector<4x1x4xf32>
    %151 = vector.shape_cast %150 : vector<4x1x4xf32> to vector<4x4xf32>
    %152 = vector.extract_strided_slice %147 {offsets = [0, 2, 0], sizes = [4, 1, 4], strides = [1, 1, 1]} : vector<4x8x4xf32> to vector<4x1x4xf32>
    %153 = vector.shape_cast %152 : vector<4x1x4xf32> to vector<4x4xf32>
    %154 = vector.extract_strided_slice %147 {offsets = [0, 3, 0], sizes = [4, 1, 4], strides = [1, 1, 1]} : vector<4x8x4xf32> to vector<4x1x4xf32>
    %155 = vector.shape_cast %154 : vector<4x1x4xf32> to vector<4x4xf32>
    %156 = vector.extract_strided_slice %147 {offsets = [0, 4, 0], sizes = [4, 1, 4], strides = [1, 1, 1]} : vector<4x8x4xf32> to vector<4x1x4xf32>
    %157 = vector.shape_cast %156 : vector<4x1x4xf32> to vector<4x4xf32>
    %158 = vector.extract_strided_slice %147 {offsets = [0, 5, 0], sizes = [4, 1, 4], strides = [1, 1, 1]} : vector<4x8x4xf32> to vector<4x1x4xf32>
    %159 = vector.shape_cast %158 : vector<4x1x4xf32> to vector<4x4xf32>
    %160 = vector.extract_strided_slice %147 {offsets = [0, 6, 0], sizes = [4, 1, 4], strides = [1, 1, 1]} : vector<4x8x4xf32> to vector<4x1x4xf32>
    %161 = vector.shape_cast %160 : vector<4x1x4xf32> to vector<4x4xf32>
    %162 = vector.extract_strided_slice %147 {offsets = [0, 7, 0], sizes = [4, 1, 4], strides = [1, 1, 1]} : vector<4x8x4xf32> to vector<4x1x4xf32>
    %163 = vector.shape_cast %162 : vector<4x1x4xf32> to vector<4x4xf32>
    %164 = vector.shape_cast %9 : vector<4x4xf32> to vector<1x4x4xf32>
    %165 = vector.shape_cast %29 : vector<4x4xf32> to vector<1x4x4xf32>
    %166 = vector.shape_cast %49 : vector<4x4xf32> to vector<1x4x4xf32>
    %167 = vector.shape_cast %69 : vector<4x4xf32> to vector<1x4x4xf32>
    %168 = vector.shape_cast %89 : vector<4x4xf32> to vector<1x4x4xf32>
    %169 = vector.shape_cast %109 : vector<4x4xf32> to vector<1x4x4xf32>
    %170 = vector.shape_cast %129 : vector<4x4xf32> to vector<1x4x4xf32>
    %171 = vector.shape_cast %149 : vector<4x4xf32> to vector<1x4x4xf32>
    %172 = tpu.concatenate %164, %165, %166, %167, %168, %169, %170, %171 in 0 : vector<1x4x4xf32>, vector<1x4x4xf32>, vector<1x4x4xf32>, vector<1x4x4xf32>, vector<1x4x4xf32>, vector<1x4x4xf32>, vector<1x4x4xf32>, vector<1x4x4xf32> -> vector<8x4x4xf32>
    %173 = vector.shape_cast %11 : vector<4x4xf32> to vector<1x4x4xf32>
    %174 = vector.shape_cast %31 : vector<4x4xf32> to vector<1x4x4xf32>
    %175 = vector.shape_cast %51 : vector<4x4xf32> to vector<1x4x4xf32>
    %176 = vector.shape_cast %71 : vector<4x4xf32> to vector<1x4x4xf32>
    %177 = vector.shape_cast %91 : vector<4x4xf32> to vector<1x4x4xf32>
    %178 = vector.shape_cast %111 : vector<4x4xf32> to vector<1x4x4xf32>
    %179 = vector.shape_cast %131 : vector<4x4xf32> to vector<1x4x4xf32>
    %180 = vector.shape_cast %151 : vector<4x4xf32> to vector<1x4x4xf32>
    %181 = tpu.concatenate %173, %174, %175, %176, %177, %178, %179, %180 in 0 : vector<1x4x4xf32>, vector<1x4x4xf32>, vector<1x4x4xf32>, vector<1x4x4xf32>, vector<1x4x4xf32>, vector<1x4x4xf32>, vector<1x4x4xf32>, vector<1x4x4xf32> -> vector<8x4x4xf32>
    %182 = vector.shape_cast %13 : vector<4x4xf32> to vector<1x4x4xf32>
    %183 = vector.shape_cast %33 : vector<4x4xf32> to vector<1x4x4xf32>
    %184 = vector.shape_cast %53 : vector<4x4xf32> to vector<1x4x4xf32>
    %185 = vector.shape_cast %73 : vector<4x4xf32> to vector<1x4x4xf32>
    %186 = vector.shape_cast %93 : vector<4x4xf32> to vector<1x4x4xf32>
    %187 = vector.shape_cast %113 : vector<4x4xf32> to vector<1x4x4xf32>
    %188 = vector.shape_cast %133 : vector<4x4xf32> to vector<1x4x4xf32>
    %189 = vector.shape_cast %153 : vector<4x4xf32> to vector<1x4x4xf32>
    %190 = tpu.concatenate %182, %183, %184, %185, %186, %187, %188, %189 in 0 : vector<1x4x4xf32>, vector<1x4x4xf32>, vector<1x4x4xf32>, vector<1x4x4xf32>, vector<1x4x4xf32>, vector<1x4x4xf32>, vector<1x4x4xf32>, vector<1x4x4xf32> -> vector<8x4x4xf32>
    %191 = vector.shape_cast %15 : vector<4x4xf32> to vector<1x4x4xf32>
    %192 = vector.shape_cast %35 : vector<4x4xf32> to vector<1x4x4xf32>
    %193 = vector.shape_cast %55 : vector<4x4xf32> to vector<1x4x4xf32>
    %194 = vector.shape_cast %75 : vector<4x4xf32> to vector<1x4x4xf32>
    %195 = vector.shape_cast %95 : vector<4x4xf32> to vector<1x4x4xf32>
    %196 = vector.shape_cast %115 : vector<4x4xf32> to vector<1x4x4xf32>
    %197 = vector.shape_cast %135 : vector<4x4xf32> to vector<1x4x4xf32>
    %198 = vector.shape_cast %155 : vector<4x4xf32> to vector<1x4x4xf32>
    %199 = tpu.concatenate %191, %192, %193, %194, %195, %196, %197, %198 in 0 : vector<1x4x4xf32>, vector<1x4x4xf32>, vector<1x4x4xf32>, vector<1x4x4xf32>, vector<1x4x4xf32>, vector<1x4x4xf32>, vector<1x4x4xf32>, vector<1x4x4xf32> -> vector<8x4x4xf32>
    %200 = vector.shape_cast %17 : vector<4x4xf32> to vector<1x4x4xf32>
    %201 = vector.shape_cast %37 : vector<4x4xf32> to vector<1x4x4xf32>
    %202 = vector.shape_cast %57 : vector<4x4xf32> to vector<1x4x4xf32>
    %203 = vector.shape_cast %77 : vector<4x4xf32> to vector<1x4x4xf32>
    %204 = vector.shape_cast %97 : vector<4x4xf32> to vector<1x4x4xf32>
    %205 = vector.shape_cast %117 : vector<4x4xf32> to vector<1x4x4xf32>
    %206 = vector.shape_cast %137 : vector<4x4xf32> to vector<1x4x4xf32>
    %207 = vector.shape_cast %157 : vector<4x4xf32> to vector<1x4x4xf32>
    %208 = tpu.concatenate %200, %201, %202, %203, %204, %205, %206, %207 in 0 : vector<1x4x4xf32>, vector<1x4x4xf32>, vector<1x4x4xf32>, vector<1x4x4xf32>, vector<1x4x4xf32>, vector<1x4x4xf32>, vector<1x4x4xf32>, vector<1x4x4xf32> -> vector<8x4x4xf32>
    %209 = vector.shape_cast %19 : vector<4x4xf32> to vector<1x4x4xf32>
    %210 = vector.shape_cast %39 : vector<4x4xf32> to vector<1x4x4xf32>
    %211 = vector.shape_cast %59 : vector<4x4xf32> to vector<1x4x4xf32>
    %212 = vector.shape_cast %79 : vector<4x4xf32> to vector<1x4x4xf32>
    %213 = vector.shape_cast %99 : vector<4x4xf32> to vector<1x4x4xf32>
    %214 = vector.shape_cast %119 : vector<4x4xf32> to vector<1x4x4xf32>
    %215 = vector.shape_cast %139 : vector<4x4xf32> to vector<1x4x4xf32>
    %216 = vector.shape_cast %159 : vector<4x4xf32> to vector<1x4x4xf32>
    %217 = tpu.concatenate %209, %210, %211, %212, %213, %214, %215, %216 in 0 : vector<1x4x4xf32>, vector<1x4x4xf32>, vector<1x4x4xf32>, vector<1x4x4xf32>, vector<1x4x4xf32>, vector<1x4x4xf32>, vector<1x4x4xf32>, vector<1x4x4xf32> -> vector<8x4x4xf32>
    %218 = vector.shape_cast %21 : vector<4x4xf32> to vector<1x4x4xf32>
    %219 = vector.shape_cast %41 : vector<4x4xf32> to vector<1x4x4xf32>
    %220 = vector.shape_cast %61 : vector<4x4xf32> to vector<1x4x4xf32>
    %221 = vector.shape_cast %81 : vector<4x4xf32> to vector<1x4x4xf32>
    %222 = vector.shape_cast %101 : vector<4x4xf32> to vector<1x4x4xf32>
    %223 = vector.shape_cast %121 : vector<4x4xf32> to vector<1x4x4xf32>
    %224 = vector.shape_cast %141 : vector<4x4xf32> to vector<1x4x4xf32>
    %225 = vector.shape_cast %161 : vector<4x4xf32> to vector<1x4x4xf32>
    %226 = tpu.concatenate %218, %219, %220, %221, %222, %223, %224, %225 in 0 : vector<1x4x4xf32>, vector<1x4x4xf32>, vector<1x4x4xf32>, vector<1x4x4xf32>, vector<1x4x4xf32>, vector<1x4x4xf32>, vector<1x4x4xf32>, vector<1x4x4xf32> -> vector<8x4x4xf32>
    %227 = vector.shape_cast %23 : vector<4x4xf32> to vector<1x4x4xf32>
    %228 = vector.shape_cast %43 : vector<4x4xf32> to vector<1x4x4xf32>
    %229 = vector.shape_cast %63 : vector<4x4xf32> to vector<1x4x4xf32>
    %230 = vector.shape_cast %83 : vector<4x4xf32> to vector<1x4x4xf32>
    %231 = vector.shape_cast %103 : vector<4x4xf32> to vector<1x4x4xf32>
    %232 = vector.shape_cast %123 : vector<4x4xf32> to vector<1x4x4xf32>
    %233 = vector.shape_cast %143 : vector<4x4xf32> to vector<1x4x4xf32>
    %234 = vector.shape_cast %163 : vector<4x4xf32> to vector<1x4x4xf32>
    %235 = tpu.concatenate %227, %228, %229, %230, %231, %232, %233, %234 in 0 : vector<1x4x4xf32>, vector<1x4x4xf32>, vector<1x4x4xf32>, vector<1x4x4xf32>, vector<1x4x4xf32>, vector<1x4x4xf32>, vector<1x4x4xf32>, vector<1x4x4xf32> -> vector<8x4x4xf32>
    %236 = tpu.concatenate %172, %181, %190, %199, %208, %217, %226, %235 in 0 : vector<8x4x4xf32>, vector<8x4x4xf32>, vector<8x4x4xf32>, vector<8x4x4xf32>, vector<8x4x4xf32>, vector<8x4x4xf32>, vector<8x4x4xf32>, vector<8x4x4xf32> -> vector<64x4x4xf32>
    %237 = vector.extract_strided_slice %236 {offsets = [0, 0, 0], sizes = [64, 1, 4], strides = [1, 1, 1]} : vector<64x4x4xf32> to vector<64x1x4xf32>
    %238 = vector.shape_cast %237 : vector<64x1x4xf32> to vector<64x4xf32>
    %239 = vector.extract_strided_slice %236 {offsets = [0, 1, 0], sizes = [64, 1, 4], strides = [1, 1, 1]} : vector<64x4x4xf32> to vector<64x1x4xf32>
    %240 = vector.shape_cast %239 : vector<64x1x4xf32> to vector<64x4xf32>
    %241 = vector.extract_strided_slice %236 {offsets = [0, 2, 0], sizes = [64, 1, 4], strides = [1, 1, 1]} : vector<64x4x4xf32> to vector<64x1x4xf32>
    %242 = vector.shape_cast %241 : vector<64x1x4xf32> to vector<64x4xf32>
    %243 = vector.extract_strided_slice %236 {offsets = [0, 3, 0], sizes = [64, 1, 4], strides = [1, 1, 1]} : vector<64x4x4xf32> to vector<64x1x4xf32>
    %244 = vector.shape_cast %243 : vector<64x1x4xf32> to vector<64x4xf32>
    %245 = tpu.concatenate %238, %240, %242, %244 in 1 : vector<64x4xf32>, vector<64x4xf32>, vector<64x4xf32>, vector<64x4xf32> -> vector<64x16xf32>
    %c0_2 = arith.constant 0 : index
    %c0_3 = arith.constant 0 : index
    %c0_4 = arith.constant 0 : index
    %246 = vector.load %arg3[%c0_2, %c0_3, %c0_4] : memref<2x64x16xf32, #tpu.memory_space<vmem>>, vector<1x64x16xf32>
    %247 = vector.shape_cast %246 : vector<1x64x16xf32> to vector<64x16xf32>
    %248 = vector.shape_cast %245 : vector<64x16xf32> to vector<1x64x16xf32>
    tpu.vector_store %arg3[%c0_2, %c0_3, %c0_4], %248 {strides = array<i32>} : memref<2x64x16xf32, #tpu.memory_space<vmem>>, vector<1x64x16xf32>,
    %c1 = arith.constant 1 : index
    %c0_5 = arith.constant 0 : index
    %c0_6 = arith.constant 0 : index
    %249 = vector.load %arg2[%c1, %c0_5, %c0_6] : memref<2x32x32xf32, #tpu.memory_space<vmem>>, vector<1x32x32xf32>
    %250 = vector.shape_cast %249 : vector<1x32x32xf32> to vector<32x32xf32>
    %251 = tpu.transpose %250, [1, 0] : vector<32x32xf32> -> vector<32x32xf32>
    %252 = vector.shape_cast %251 : vector<32x32xf32> to vector<4x8x32xf32>
    %253 = vector.extract_strided_slice %252 {offsets = [0, 0, 0], sizes = [4, 1, 32], strides = [1, 1, 1]} : vector<4x8x32xf32> to vector<4x1x32xf32>
    %254 = vector.shape_cast %253 : vector<4x1x32xf32> to vector<4x32xf32>
    %255 = tpu.transpose %254, [1, 0] : vector<4x32xf32> -> vector<32x4xf32>
    %256 = vector.shape_cast %255 : vector<32x4xf32> to vector<4x8x4xf32>
    %257 = vector.extract_strided_slice %256 {offsets = [0, 0, 0], sizes = [4, 1, 4], strides = [1, 1, 1]} : vector<4x8x4xf32> to vector<4x1x4xf32>
    %258 = vector.shape_cast %257 : vector<4x1x4xf32> to vector<4x4xf32>
    %259 = vector.extract_strided_slice %256 {offsets = [0, 1, 0], sizes = [4, 1, 4], strides = [1, 1, 1]} : vector<4x8x4xf32> to vector<4x1x4xf32>
    %260 = vector.shape_cast %259 : vector<4x1x4xf32> to vector<4x4xf32>
    %261 = vector.extract_strided_slice %256 {offsets = [0, 2, 0], sizes = [4, 1, 4], strides = [1, 1, 1]} : vector<4x8x4xf32> to vector<4x1x4xf32>
    %262 = vector.shape_cast %261 : vector<4x1x4xf32> to vector<4x4xf32>
    %263 = vector.extract_strided_slice %256 {offsets = [0, 3, 0], sizes = [4, 1, 4], strides = [1, 1, 1]} : vector<4x8x4xf32> to vector<4x1x4xf32>
    %264 = vector.shape_cast %263 : vector<4x1x4xf32> to vector<4x4xf32>
    %265 = vector.extract_strided_slice %256 {offsets = [0, 4, 0], sizes = [4, 1, 4], strides = [1, 1, 1]} : vector<4x8x4xf32> to vector<4x1x4xf32>
    %266 = vector.shape_cast %265 : vector<4x1x4xf32> to vector<4x4xf32>
    %267 = vector.extract_strided_slice %256 {offsets = [0, 5, 0], sizes = [4, 1, 4], strides = [1, 1, 1]} : vector<4x8x4xf32> to vector<4x1x4xf32>
    %268 = vector.shape_cast %267 : vector<4x1x4xf32> to vector<4x4xf32>
    %269 = vector.extract_strided_slice %256 {offsets = [0, 6, 0], sizes = [4, 1, 4], strides = [1, 1, 1]} : vector<4x8x4xf32> to vector<4x1x4xf32>
    %270 = vector.shape_cast %269 : vector<4x1x4xf32> to vector<4x4xf32>
    %271 = vector.extract_strided_slice %256 {offsets = [0, 7, 0], sizes = [4, 1, 4], strides = [1, 1, 1]} : vector<4x8x4xf32> to vector<4x1x4xf32>
    %272 = vector.shape_cast %271 : vector<4x1x4xf32> to vector<4x4xf32>
    %273 = vector.extract_strided_slice %252 {offsets = [0, 1, 0], sizes = [4, 1, 32], strides = [1, 1, 1]} : vector<4x8x32xf32> to vector<4x1x32xf32>
    %274 = vector.shape_cast %273 : vector<4x1x32xf32> to vector<4x32xf32>
    %275 = tpu.transpose %274, [1, 0] : vector<4x32xf32> -> vector<32x4xf32>
    %276 = vector.shape_cast %275 : vector<32x4xf32> to vector<4x8x4xf32>
    %277 = vector.extract_strided_slice %276 {offsets = [0, 0, 0], sizes = [4, 1, 4], strides = [1, 1, 1]} : vector<4x8x4xf32> to vector<4x1x4xf32>
    %278 = vector.shape_cast %277 : vector<4x1x4xf32> to vector<4x4xf32>
    %279 = vector.extract_strided_slice %276 {offsets = [0, 1, 0], sizes = [4, 1, 4], strides = [1, 1, 1]} : vector<4x8x4xf32> to vector<4x1x4xf32>
    %280 = vector.shape_cast %279 : vector<4x1x4xf32> to vector<4x4xf32>
    %281 = vector.extract_strided_slice %276 {offsets = [0, 2, 0], sizes = [4, 1, 4], strides = [1, 1, 1]} : vector<4x8x4xf32> to vector<4x1x4xf32>
    %282 = vector.shape_cast %281 : vector<4x1x4xf32> to vector<4x4xf32>
    %283 = vector.extract_strided_slice %276 {offsets = [0, 3, 0], sizes = [4, 1, 4], strides = [1, 1, 1]} : vector<4x8x4xf32> to vector<4x1x4xf32>
    %284 = vector.shape_cast %283 : vector<4x1x4xf32> to vector<4x4xf32>
    %285 = vector.extract_strided_slice %276 {offsets = [0, 4, 0], sizes = [4, 1, 4], strides = [1, 1, 1]} : vector<4x8x4xf32> to vector<4x1x4xf32>
    %286 = vector.shape_cast %285 : vector<4x1x4xf32> to vector<4x4xf32>
    %287 = vector.extract_strided_slice %276 {offsets = [0, 5, 0], sizes = [4, 1, 4], strides = [1, 1, 1]} : vector<4x8x4xf32> to vector<4x1x4xf32>
    %288 = vector.shape_cast %287 : vector<4x1x4xf32> to vector<4x4xf32>
    %289 = vector.extract_strided_slice %276 {offsets = [0, 6, 0], sizes = [4, 1, 4], strides = [1, 1, 1]} : vector<4x8x4xf32> to vector<4x1x4xf32>
    %290 = vector.shape_cast %289 : vector<4x1x4xf32> to vector<4x4xf32>
    %291 = vector.extract_strided_slice %276 {offsets = [0, 7, 0], sizes = [4, 1, 4], strides = [1, 1, 1]} : vector<4x8x4xf32> to vector<4x1x4xf32>
    %292 = vector.shape_cast %291 : vector<4x1x4xf32> to vector<4x4xf32>
    %293 = vector.extract_strided_slice %252 {offsets = [0, 2, 0], sizes = [4, 1, 32], strides = [1, 1, 1]} : vector<4x8x32xf32> to vector<4x1x32xf32>
    %294 = vector.shape_cast %293 : vector<4x1x32xf32> to vector<4x32xf32>
    %295 = tpu.transpose %294, [1, 0] : vector<4x32xf32> -> vector<32x4xf32>
    %296 = vector.shape_cast %295 : vector<32x4xf32> to vector<4x8x4xf32>
    %297 = vector.extract_strided_slice %296 {offsets = [0, 0, 0], sizes = [4, 1, 4], strides = [1, 1, 1]} : vector<4x8x4xf32> to vector<4x1x4xf32>
    %298 = vector.shape_cast %297 : vector<4x1x4xf32> to vector<4x4xf32>
    %299 = vector.extract_strided_slice %296 {offsets = [0, 1, 0], sizes = [4, 1, 4], strides = [1, 1, 1]} : vector<4x8x4xf32> to vector<4x1x4xf32>
    %300 = vector.shape_cast %299 : vector<4x1x4xf32> to vector<4x4xf32>
    %301 = vector.extract_strided_slice %296 {offsets = [0, 2, 0], sizes = [4, 1, 4], strides = [1, 1, 1]} : vector<4x8x4xf32> to vector<4x1x4xf32>
    %302 = vector.shape_cast %301 : vector<4x1x4xf32> to vector<4x4xf32>
    %303 = vector.extract_strided_slice %296 {offsets = [0, 3, 0], sizes = [4, 1, 4], strides = [1, 1, 1]} : vector<4x8x4xf32> to vector<4x1x4xf32>
    %304 = vector.shape_cast %303 : vector<4x1x4xf32> to vector<4x4xf32>
    %305 = vector.extract_strided_slice %296 {offsets = [0, 4, 0], sizes = [4, 1, 4], strides = [1, 1, 1]} : vector<4x8x4xf32> to vector<4x1x4xf32>
    %306 = vector.shape_cast %305 : vector<4x1x4xf32> to vector<4x4xf32>
    %307 = vector.extract_strided_slice %296 {offsets = [0, 5, 0], sizes = [4, 1, 4], strides = [1, 1, 1]} : vector<4x8x4xf32> to vector<4x1x4xf32>
    %308 = vector.shape_cast %307 : vector<4x1x4xf32> to vector<4x4xf32>
    %309 = vector.extract_strided_slice %296 {offsets = [0, 6, 0], sizes = [4, 1, 4], strides = [1, 1, 1]} : vector<4x8x4xf32> to vector<4x1x4xf32>
    %310 = vector.shape_cast %309 : vector<4x1x4xf32> to vector<4x4xf32>
    %311 = vector.extract_strided_slice %296 {offsets = [0, 7, 0], sizes = [4, 1, 4], strides = [1, 1, 1]} : vector<4x8x4xf32> to vector<4x1x4xf32>
    %312 = vector.shape_cast %311 : vector<4x1x4xf32> to vector<4x4xf32>
    %313 = vector.extract_strided_slice %252 {offsets = [0, 3, 0], sizes = [4, 1, 32], strides = [1, 1, 1]} : vector<4x8x32xf32> to vector<4x1x32xf32>
    %314 = vector.shape_cast %313 : vector<4x1x32xf32> to vector<4x32xf32>
    %315 = tpu.transpose %314, [1, 0] : vector<4x32xf32> -> vector<32x4xf32>
    %316 = vector.shape_cast %315 : vector<32x4xf32> to vector<4x8x4xf32>
    %317 = vector.extract_strided_slice %316 {offsets = [0, 0, 0], sizes = [4, 1, 4], strides = [1, 1, 1]} : vector<4x8x4xf32> to vector<4x1x4xf32>
    %318 = vector.shape_cast %317 : vector<4x1x4xf32> to vector<4x4xf32>
    %319 = vector.extract_strided_slice %316 {offsets = [0, 1, 0], sizes = [4, 1, 4], strides = [1, 1, 1]} : vector<4x8x4xf32> to vector<4x1x4xf32>
    %320 = vector.shape_cast %319 : vector<4x1x4xf32> to vector<4x4xf32>
    %321 = vector.extract_strided_slice %316 {offsets = [0, 2, 0], sizes = [4, 1, 4], strides = [1, 1, 1]} : vector<4x8x4xf32> to vector<4x1x4xf32>
    %322 = vector.shape_cast %321 : vector<4x1x4xf32> to vector<4x4xf32>
    %323 = vector.extract_strided_slice %316 {offsets = [0, 3, 0], sizes = [4, 1, 4], strides = [1, 1, 1]} : vector<4x8x4xf32> to vector<4x1x4xf32>
    %324 = vector.shape_cast %323 : vector<4x1x4xf32> to vector<4x4xf32>
    %325 = vector.extract_strided_slice %316 {offsets = [0, 4, 0], sizes = [4, 1, 4], strides = [1, 1, 1]} : vector<4x8x4xf32> to vector<4x1x4xf32>
    %326 = vector.shape_cast %325 : vector<4x1x4xf32> to vector<4x4xf32>
    %327 = vector.extract_strided_slice %316 {offsets = [0, 5, 0], sizes = [4, 1, 4], strides = [1, 1, 1]} : vector<4x8x4xf32> to vector<4x1x4xf32>
    %328 = vector.shape_cast %327 : vector<4x1x4xf32> to vector<4x4xf32>
    %329 = vector.extract_strided_slice %316 {offsets = [0, 6, 0], sizes = [4, 1, 4], strides = [1, 1, 1]} : vector<4x8x4xf32> to vector<4x1x4xf32>
    %330 = vector.shape_cast %329 : vector<4x1x4xf32> to vector<4x4xf32>
    %331 = vector.extract_strided_slice %316 {offsets = [0, 7, 0], sizes = [4, 1, 4], strides = [1, 1, 1]} : vector<4x8x4xf32> to vector<4x1x4xf32>
    %332 = vector.shape_cast %331 : vector<4x1x4xf32> to vector<4x4xf32>
    %333 = vector.extract_strided_slice %252 {offsets = [0, 4, 0], sizes = [4, 1, 32], strides = [1, 1, 1]} : vector<4x8x32xf32> to vector<4x1x32xf32>
    %334 = vector.shape_cast %333 : vector<4x1x32xf32> to vector<4x32xf32>
    %335 = tpu.transpose %334, [1, 0] : vector<4x32xf32> -> vector<32x4xf32>
    %336 = vector.shape_cast %335 : vector<32x4xf32> to vector<4x8x4xf32>
    %337 = vector.extract_strided_slice %336 {offsets = [0, 0, 0], sizes = [4, 1, 4], strides = [1, 1, 1]} : vector<4x8x4xf32> to vector<4x1x4xf32>
    %338 = vector.shape_cast %337 : vector<4x1x4xf32> to vector<4x4xf32>
    %339 = vector.extract_strided_slice %336 {offsets = [0, 1, 0], sizes = [4, 1, 4], strides = [1, 1, 1]} : vector<4x8x4xf32> to vector<4x1x4xf32>
    %340 = vector.shape_cast %339 : vector<4x1x4xf32> to vector<4x4xf32>
    %341 = vector.extract_strided_slice %336 {offsets = [0, 2, 0], sizes = [4, 1, 4], strides = [1, 1, 1]} : vector<4x8x4xf32> to vector<4x1x4xf32>
    %342 = vector.shape_cast %341 : vector<4x1x4xf32> to vector<4x4xf32>
    %343 = vector.extract_strided_slice %336 {offsets = [0, 3, 0], sizes = [4, 1, 4], strides = [1, 1, 1]} : vector<4x8x4xf32> to vector<4x1x4xf32>
    %344 = vector.shape_cast %343 : vector<4x1x4xf32> to vector<4x4xf32>
    %345 = vector.extract_strided_slice %336 {offsets = [0, 4, 0], sizes = [4, 1, 4], strides = [1, 1, 1]} : vector<4x8x4xf32> to vector<4x1x4xf32>
    %346 = vector.shape_cast %345 : vector<4x1x4xf32> to vector<4x4xf32>
    %347 = vector.extract_strided_slice %336 {offsets = [0, 5, 0], sizes = [4, 1, 4], strides = [1, 1, 1]} : vector<4x8x4xf32> to vector<4x1x4xf32>
    %348 = vector.shape_cast %347 : vector<4x1x4xf32> to vector<4x4xf32>
    %349 = vector.extract_strided_slice %336 {offsets = [0, 6, 0], sizes = [4, 1, 4], strides = [1, 1, 1]} : vector<4x8x4xf32> to vector<4x1x4xf32>
    %350 = vector.shape_cast %349 : vector<4x1x4xf32> to vector<4x4xf32>
    %351 = vector.extract_strided_slice %336 {offsets = [0, 7, 0], sizes = [4, 1, 4], strides = [1, 1, 1]} : vector<4x8x4xf32> to vector<4x1x4xf32>
    %352 = vector.shape_cast %351 : vector<4x1x4xf32> to vector<4x4xf32>
    %353 = vector.extract_strided_slice %252 {offsets = [0, 5, 0], sizes = [4, 1, 32], strides = [1, 1, 1]} : vector<4x8x32xf32> to vector<4x1x32xf32>
    %354 = vector.shape_cast %353 : vector<4x1x32xf32> to vector<4x32xf32>
    %355 = tpu.transpose %354, [1, 0] : vector<4x32xf32> -> vector<32x4xf32>
    %356 = vector.shape_cast %355 : vector<32x4xf32> to vector<4x8x4xf32>
    %357 = vector.extract_strided_slice %356 {offsets = [0, 0, 0], sizes = [4, 1, 4], strides = [1, 1, 1]} : vector<4x8x4xf32> to vector<4x1x4xf32>
    %358 = vector.shape_cast %357 : vector<4x1x4xf32> to vector<4x4xf32>
    %359 = vector.extract_strided_slice %356 {offsets = [0, 1, 0], sizes = [4, 1, 4], strides = [1, 1, 1]} : vector<4x8x4xf32> to vector<4x1x4xf32>
    %360 = vector.shape_cast %359 : vector<4x1x4xf32> to vector<4x4xf32>
    %361 = vector.extract_strided_slice %356 {offsets = [0, 2, 0], sizes = [4, 1, 4], strides = [1, 1, 1]} : vector<4x8x4xf32> to vector<4x1x4xf32>
    %362 = vector.shape_cast %361 : vector<4x1x4xf32> to vector<4x4xf32>
    %363 = vector.extract_strided_slice %356 {offsets = [0, 3, 0], sizes = [4, 1, 4], strides = [1, 1, 1]} : vector<4x8x4xf32> to vector<4x1x4xf32>
    %364 = vector.shape_cast %363 : vector<4x1x4xf32> to vector<4x4xf32>
    %365 = vector.extract_strided_slice %356 {offsets = [0, 4, 0], sizes = [4, 1, 4], strides = [1, 1, 1]} : vector<4x8x4xf32> to vector<4x1x4xf32>
    %366 = vector.shape_cast %365 : vector<4x1x4xf32> to vector<4x4xf32>
    %367 = vector.extract_strided_slice %356 {offsets = [0, 5, 0], sizes = [4, 1, 4], strides = [1, 1, 1]} : vector<4x8x4xf32> to vector<4x1x4xf32>
    %368 = vector.shape_cast %367 : vector<4x1x4xf32> to vector<4x4xf32>
    %369 = vector.extract_strided_slice %356 {offsets = [0, 6, 0], sizes = [4, 1, 4], strides = [1, 1, 1]} : vector<4x8x4xf32> to vector<4x1x4xf32>
    %370 = vector.shape_cast %369 : vector<4x1x4xf32> to vector<4x4xf32>
    %371 = vector.extract_strided_slice %356 {offsets = [0, 7, 0], sizes = [4, 1, 4], strides = [1, 1, 1]} : vector<4x8x4xf32> to vector<4x1x4xf32>
    %372 = vector.shape_cast %371 : vector<4x1x4xf32> to vector<4x4xf32>
    %373 = vector.extract_strided_slice %252 {offsets = [0, 6, 0], sizes = [4, 1, 32], strides = [1, 1, 1]} : vector<4x8x32xf32> to vector<4x1x32xf32>
    %374 = vector.shape_cast %373 : vector<4x1x32xf32> to vector<4x32xf32>
    %375 = tpu.transpose %374, [1, 0] : vector<4x32xf32> -> vector<32x4xf32>
    %376 = vector.shape_cast %375 : vector<32x4xf32> to vector<4x8x4xf32>
    %377 = vector.extract_strided_slice %376 {offsets = [0, 0, 0], sizes = [4, 1, 4], strides = [1, 1, 1]} : vector<4x8x4xf32> to vector<4x1x4xf32>
    %378 = vector.shape_cast %377 : vector<4x1x4xf32> to vector<4x4xf32>
    %379 = vector.extract_strided_slice %376 {offsets = [0, 1, 0], sizes = [4, 1, 4], strides = [1, 1, 1]} : vector<4x8x4xf32> to vector<4x1x4xf32>
    %380 = vector.shape_cast %379 : vector<4x1x4xf32> to vector<4x4xf32>
    %381 = vector.extract_strided_slice %376 {offsets = [0, 2, 0], sizes = [4, 1, 4], strides = [1, 1, 1]} : vector<4x8x4xf32> to vector<4x1x4xf32>
    %382 = vector.shape_cast %381 : vector<4x1x4xf32> to vector<4x4xf32>
    %383 = vector.extract_strided_slice %376 {offsets = [0, 3, 0], sizes = [4, 1, 4], strides = [1, 1, 1]} : vector<4x8x4xf32> to vector<4x1x4xf32>
    %384 = vector.shape_cast %383 : vector<4x1x4xf32> to vector<4x4xf32>
    %385 = vector.extract_strided_slice %376 {offsets = [0, 4, 0], sizes = [4, 1, 4], strides = [1, 1, 1]} : vector<4x8x4xf32> to vector<4x1x4xf32>
    %386 = vector.shape_cast %385 : vector<4x1x4xf32> to vector<4x4xf32>
    %387 = vector.extract_strided_slice %376 {offsets = [0, 5, 0], sizes = [4, 1, 4], strides = [1, 1, 1]} : vector<4x8x4xf32> to vector<4x1x4xf32>
    %388 = vector.shape_cast %387 : vector<4x1x4xf32> to vector<4x4xf32>
    %389 = vector.extract_strided_slice %376 {offsets = [0, 6, 0], sizes = [4, 1, 4], strides = [1, 1, 1]} : vector<4x8x4xf32> to vector<4x1x4xf32>
    %390 = vector.shape_cast %389 : vector<4x1x4xf32> to vector<4x4xf32>
    %391 = vector.extract_strided_slice %376 {offsets = [0, 7, 0], sizes = [4, 1, 4], strides = [1, 1, 1]} : vector<4x8x4xf32> to vector<4x1x4xf32>
    %392 = vector.shape_cast %391 : vector<4x1x4xf32> to vector<4x4xf32>
    %393 = vector.extract_strided_slice %252 {offsets = [0, 7, 0], sizes = [4, 1, 32], strides = [1, 1, 1]} : vector<4x8x32xf32> to vector<4x1x32xf32>
    %394 = vector.shape_cast %393 : vector<4x1x32xf32> to vector<4x32xf32>
    %395 = tpu.transpose %394, [1, 0] : vector<4x32xf32> -> vector<32x4xf32>
    %396 = vector.shape_cast %395 : vector<32x4xf32> to vector<4x8x4xf32>
    %397 = vector.extract_strided_slice %396 {offsets = [0, 0, 0], sizes = [4, 1, 4], strides = [1, 1, 1]} : vector<4x8x4xf32> to vector<4x1x4xf32>
    %398 = vector.shape_cast %397 : vector<4x1x4xf32> to vector<4x4xf32>
    %399 = vector.extract_strided_slice %396 {offsets = [0, 1, 0], sizes = [4, 1, 4], strides = [1, 1, 1]} : vector<4x8x4xf32> to vector<4x1x4xf32>
    %400 = vector.shape_cast %399 : vector<4x1x4xf32> to vector<4x4xf32>
    %401 = vector.extract_strided_slice %396 {offsets = [0, 2, 0], sizes = [4, 1, 4], strides = [1, 1, 1]} : vector<4x8x4xf32> to vector<4x1x4xf32>
    %402 = vector.shape_cast %401 : vector<4x1x4xf32> to vector<4x4xf32>
    %403 = vector.extract_strided_slice %396 {offsets = [0, 3, 0], sizes = [4, 1, 4], strides = [1, 1, 1]} : vector<4x8x4xf32> to vector<4x1x4xf32>
    %404 = vector.shape_cast %403 : vector<4x1x4xf32> to vector<4x4xf32>
    %405 = vector.extract_strided_slice %396 {offsets = [0, 4, 0], sizes = [4, 1, 4], strides = [1, 1, 1]} : vector<4x8x4xf32> to vector<4x1x4xf32>
    %406 = vector.shape_cast %405 : vector<4x1x4xf32> to vector<4x4xf32>
    %407 = vector.extract_strided_slice %396 {offsets = [0, 5, 0], sizes = [4, 1, 4], strides = [1, 1, 1]} : vector<4x8x4xf32> to vector<4x1x4xf32>
    %408 = vector.shape_cast %407 : vector<4x1x4xf32> to vector<4x4xf32>
    %409 = vector.extract_strided_slice %396 {offsets = [0, 6, 0], sizes = [4, 1, 4], strides = [1, 1, 1]} : vector<4x8x4xf32> to vector<4x1x4xf32>
    %410 = vector.shape_cast %409 : vector<4x1x4xf32> to vector<4x4xf32>
    %411 = vector.extract_strided_slice %396 {offsets = [0, 7, 0], sizes = [4, 1, 4], strides = [1, 1, 1]} : vector<4x8x4xf32> to vector<4x1x4xf32>
    %412 = vector.shape_cast %411 : vector<4x1x4xf32> to vector<4x4xf32>
    %413 = vector.shape_cast %258 : vector<4x4xf32> to vector<1x4x4xf32>
    %414 = vector.shape_cast %278 : vector<4x4xf32> to vector<1x4x4xf32>
    %415 = vector.shape_cast %298 : vector<4x4xf32> to vector<1x4x4xf32>
    %416 = vector.shape_cast %318 : vector<4x4xf32> to vector<1x4x4xf32>
    %417 = vector.shape_cast %338 : vector<4x4xf32> to vector<1x4x4xf32>
    %418 = vector.shape_cast %358 : vector<4x4xf32> to vector<1x4x4xf32>
    %419 = vector.shape_cast %378 : vector<4x4xf32> to vector<1x4x4xf32>
    %420 = vector.shape_cast %398 : vector<4x4xf32> to vector<1x4x4xf32>
    %421 = tpu.concatenate %413, %414, %415, %416, %417, %418, %419, %420 in 0 : vector<1x4x4xf32>, vector<1x4x4xf32>, vector<1x4x4xf32>, vector<1x4x4xf32>, vector<1x4x4xf32>, vector<1x4x4xf32>, vector<1x4x4xf32>, vector<1x4x4xf32> -> vector<8x4x4xf32>
    %422 = vector.shape_cast %260 : vector<4x4xf32> to vector<1x4x4xf32>
    %423 = vector.shape_cast %280 : vector<4x4xf32> to vector<1x4x4xf32>
    %424 = vector.shape_cast %300 : vector<4x4xf32> to vector<1x4x4xf32>
    %425 = vector.shape_cast %320 : vector<4x4xf32> to vector<1x4x4xf32>
    %426 = vector.shape_cast %340 : vector<4x4xf32> to vector<1x4x4xf32>
    %427 = vector.shape_cast %360 : vector<4x4xf32> to vector<1x4x4xf32>
    %428 = vector.shape_cast %380 : vector<4x4xf32> to vector<1x4x4xf32>
    %429 = vector.shape_cast %400 : vector<4x4xf32> to vector<1x4x4xf32>
    %430 = tpu.concatenate %422, %423, %424, %425, %426, %427, %428, %429 in 0 : vector<1x4x4xf32>, vector<1x4x4xf32>, vector<1x4x4xf32>, vector<1x4x4xf32>, vector<1x4x4xf32>, vector<1x4x4xf32>, vector<1x4x4xf32>, vector<1x4x4xf32> -> vector<8x4x4xf32>
    %431 = vector.shape_cast %262 : vector<4x4xf32> to vector<1x4x4xf32>
    %432 = vector.shape_cast %282 : vector<4x4xf32> to vector<1x4x4xf32>
    %433 = vector.shape_cast %302 : vector<4x4xf32> to vector<1x4x4xf32>
    %434 = vector.shape_cast %322 : vector<4x4xf32> to vector<1x4x4xf32>
    %435 = vector.shape_cast %342 : vector<4x4xf32> to vector<1x4x4xf32>
    %436 = vector.shape_cast %362 : vector<4x4xf32> to vector<1x4x4xf32>
    %437 = vector.shape_cast %382 : vector<4x4xf32> to vector<1x4x4xf32>
    %438 = vector.shape_cast %402 : vector<4x4xf32> to vector<1x4x4xf32>
    %439 = tpu.concatenate %431, %432, %433, %434, %435, %436, %437, %438 in 0 : vector<1x4x4xf32>, vector<1x4x4xf32>, vector<1x4x4xf32>, vector<1x4x4xf32>, vector<1x4x4xf32>, vector<1x4x4xf32>, vector<1x4x4xf32>, vector<1x4x4xf32> -> vector<8x4x4xf32>
    %440 = vector.shape_cast %264 : vector<4x4xf32> to vector<1x4x4xf32>
    %441 = vector.shape_cast %284 : vector<4x4xf32> to vector<1x4x4xf32>
    %442 = vector.shape_cast %304 : vector<4x4xf32> to vector<1x4x4xf32>
    %443 = vector.shape_cast %324 : vector<4x4xf32> to vector<1x4x4xf32>
    %444 = vector.shape_cast %344 : vector<4x4xf32> to vector<1x4x4xf32>
    %445 = vector.shape_cast %364 : vector<4x4xf32> to vector<1x4x4xf32>
    %446 = vector.shape_cast %384 : vector<4x4xf32> to vector<1x4x4xf32>
    %447 = vector.shape_cast %404 : vector<4x4xf32> to vector<1x4x4xf32>
    %448 = tpu.concatenate %440, %441, %442, %443, %444, %445, %446, %447 in 0 : vector<1x4x4xf32>, vector<1x4x4xf32>, vector<1x4x4xf32>, vector<1x4x4xf32>, vector<1x4x4xf32>, vector<1x4x4xf32>, vector<1x4x4xf32>, vector<1x4x4xf32> -> vector<8x4x4xf32>
    %449 = vector.shape_cast %266 : vector<4x4xf32> to vector<1x4x4xf32>
    %450 = vector.shape_cast %286 : vector<4x4xf32> to vector<1x4x4xf32>
    %451 = vector.shape_cast %306 : vector<4x4xf32> to vector<1x4x4xf32>
    %452 = vector.shape_cast %326 : vector<4x4xf32> to vector<1x4x4xf32>
    %453 = vector.shape_cast %346 : vector<4x4xf32> to vector<1x4x4xf32>
    %454 = vector.shape_cast %366 : vector<4x4xf32> to vector<1x4x4xf32>
    %455 = vector.shape_cast %386 : vector<4x4xf32> to vector<1x4x4xf32>
    %456 = vector.shape_cast %406 : vector<4x4xf32> to vector<1x4x4xf32>
    %457 = tpu.concatenate %449, %450, %451, %452, %453, %454, %455, %456 in 0 : vector<1x4x4xf32>, vector<1x4x4xf32>, vector<1x4x4xf32>, vector<1x4x4xf32>, vector<1x4x4xf32>, vector<1x4x4xf32>, vector<1x4x4xf32>, vector<1x4x4xf32> -> vector<8x4x4xf32>
    %458 = vector.shape_cast %268 : vector<4x4xf32> to vector<1x4x4xf32>
    %459 = vector.shape_cast %288 : vector<4x4xf32> to vector<1x4x4xf32>
    %460 = vector.shape_cast %308 : vector<4x4xf32> to vector<1x4x4xf32>
    %461 = vector.shape_cast %328 : vector<4x4xf32> to vector<1x4x4xf32>
    %462 = vector.shape_cast %348 : vector<4x4xf32> to vector<1x4x4xf32>
    %463 = vector.shape_cast %368 : vector<4x4xf32> to vector<1x4x4xf32>
    %464 = vector.shape_cast %388 : vector<4x4xf32> to vector<1x4x4xf32>
    %465 = vector.shape_cast %408 : vector<4x4xf32> to vector<1x4x4xf32>
    %466 = tpu.concatenate %458, %459, %460, %461, %462, %463, %464, %465 in 0 : vector<1x4x4xf32>, vector<1x4x4xf32>, vector<1x4x4xf32>, vector<1x4x4xf32>, vector<1x4x4xf32>, vector<1x4x4xf32>, vector<1x4x4xf32>, vector<1x4x4xf32> -> vector<8x4x4xf32>
    %467 = vector.shape_cast %270 : vector<4x4xf32> to vector<1x4x4xf32>
    %468 = vector.shape_cast %290 : vector<4x4xf32> to vector<1x4x4xf32>
    %469 = vector.shape_cast %310 : vector<4x4xf32> to vector<1x4x4xf32>
    %470 = vector.shape_cast %330 : vector<4x4xf32> to vector<1x4x4xf32>
    %471 = vector.shape_cast %350 : vector<4x4xf32> to vector<1x4x4xf32>
    %472 = vector.shape_cast %370 : vector<4x4xf32> to vector<1x4x4xf32>
    %473 = vector.shape_cast %390 : vector<4x4xf32> to vector<1x4x4xf32>
    %474 = vector.shape_cast %410 : vector<4x4xf32> to vector<1x4x4xf32>
    %475 = tpu.concatenate %467, %468, %469, %470, %471, %472, %473, %474 in 0 : vector<1x4x4xf32>, vector<1x4x4xf32>, vector<1x4x4xf32>, vector<1x4x4xf32>, vector<1x4x4xf32>, vector<1x4x4xf32>, vector<1x4x4xf32>, vector<1x4x4xf32> -> vector<8x4x4xf32>
    %476 = vector.shape_cast %272 : vector<4x4xf32> to vector<1x4x4xf32>
    %477 = vector.shape_cast %292 : vector<4x4xf32> to vector<1x4x4xf32>
    %478 = vector.shape_cast %312 : vector<4x4xf32> to vector<1x4x4xf32>
    %479 = vector.shape_cast %332 : vector<4x4xf32> to vector<1x4x4xf32>
    %480 = vector.shape_cast %352 : vector<4x4xf32> to vector<1x4x4xf32>
    %481 = vector.shape_cast %372 : vector<4x4xf32> to vector<1x4x4xf32>
    %482 = vector.shape_cast %392 : vector<4x4xf32> to vector<1x4x4xf32>
    %483 = vector.shape_cast %412 : vector<4x4xf32> to vector<1x4x4xf32>
    %484 = tpu.concatenate %476, %477, %478, %479, %480, %481, %482, %483 in 0 : vector<1x4x4xf32>, vector<1x4x4xf32>, vector<1x4x4xf32>, vector<1x4x4xf32>, vector<1x4x4xf32>, vector<1x4x4xf32>, vector<1x4x4xf32>, vector<1x4x4xf32> -> vector<8x4x4xf32>
    %485 = tpu.concatenate %421, %430, %439, %448, %457, %466, %475, %484 in 0 : vector<8x4x4xf32>, vector<8x4x4xf32>, vector<8x4x4xf32>, vector<8x4x4xf32>, vector<8x4x4xf32>, vector<8x4x4xf32>, vector<8x4x4xf32>, vector<8x4x4xf32> -> vector<64x4x4xf32>
    %486 = vector.extract_strided_slice %485 {offsets = [0, 0, 0], sizes = [64, 1, 4], strides = [1, 1, 1]} : vector<64x4x4xf32> to vector<64x1x4xf32>
    %487 = vector.shape_cast %486 : vector<64x1x4xf32> to vector<64x4xf32>
    %488 = vector.extract_strided_slice %485 {offsets = [0, 1, 0], sizes = [64, 1, 4], strides = [1, 1, 1]} : vector<64x4x4xf32> to vector<64x1x4xf32>
    %489 = vector.shape_cast %488 : vector<64x1x4xf32> to vector<64x4xf32>
    %490 = vector.extract_strided_slice %485 {offsets = [0, 2, 0], sizes = [64, 1, 4], strides = [1, 1, 1]} : vector<64x4x4xf32> to vector<64x1x4xf32>
    %491 = vector.shape_cast %490 : vector<64x1x4xf32> to vector<64x4xf32>
    %492 = vector.extract_strided_slice %485 {offsets = [0, 3, 0], sizes = [64, 1, 4], strides = [1, 1, 1]} : vector<64x4x4xf32> to vector<64x1x4xf32>
    %493 = vector.shape_cast %492 : vector<64x1x4xf32> to vector<64x4xf32>
    %494 = tpu.concatenate %487, %489, %491, %493 in 1 : vector<64x4xf32>, vector<64x4xf32>, vector<64x4xf32>, vector<64x4xf32> -> vector<64x16xf32>
    %c1_7 = arith.constant 1 : index
    %c0_8 = arith.constant 0 : index
    %c0_9 = arith.constant 0 : index
    %495 = vector.load %arg3[%c1_7, %c0_8, %c0_9] : memref<2x64x16xf32, #tpu.memory_space<vmem>>, vector<1x64x16xf32>
    %496 = vector.shape_cast %495 : vector<1x64x16xf32> to vector<64x16xf32>
    %497 = vector.shape_cast %494 : vector<64x16xf32> to vector<1x64x16xf32>
    tpu.vector_store %arg3[%c1_7, %c0_8, %c0_9], %497 {strides = array<i32>} : memref<2x64x16xf32, #tpu.memory_space<vmem>>, vector<1x64x16xf32>,
    return
  }
  func.func @transform_0(%arg0: i32, %arg1: i32) -> (i32, i32, i32) {
    %c0_i32 = arith.constant 0 : i32
    %c0_i32_0 = arith.constant 0 : i32
    return %arg0, %arg1, %c0_i32 : i32, i32, i32
  }
  func.func @transform_1(%arg0: i32, %arg1: i32) -> (i32, i32, i32) {
    %c0_i32 = arith.constant 0 : i32
    %c0_i32_0 = arith.constant 0 : i32
    return %arg0, %c0_i32, %arg1 : i32, i32, i32
  }
}

</mosaic_0001>

<bundles_post_ra>
// kernel: pixelshuffle_down.1
= control target key start
LH: loop header
LB: loop body
LE: loop exit
PB: predicated region body
PF: predicated region fallthrough
CT: control target
= control target key end

     0   :  { %6 = vsyncpa [#allocation3], 0  ;;  %s2706_s9 = smov [#allocation2]   ;;  %s2707_s11 = smov 128   ;;  %s4387_s0 = inlined_call_operand.hbm [shape: f32[2,32,32], index: 0, kind: input, shape index: {}]   ;;  %s4388_s1 = inlined_call_operand.vmem [shape: f32[2,64,16], index: 1, kind: output, shape index: {}]  }
   0x1   :  { %s11_s8 = sshll.u32 %s4387_s0, 4  ;;  %s13_s10 = sshll.u32 %s2706_s9, 4  ;;  %s12_s8 = int_to_ptr.hbm [resolvable:$true] %s11_s8  ;;  %s14_s10 = int_to_ptr.vmem [resolvable:$true] %s13_s10 }
   0x2   :  { %s2708_s12 = smov 8  }
   0x3   :  { %19 = dma.hbm_to_vmem [thread:$0]  %s12_s8, 1024, %s14_s10, [#allocation3], %s2707_s11, %s2707_s11, %s2708_s12  }
   0x4   :  { %2704 = dma.done.wait [#allocation3], 1024  }
   0x5   :  { %2705 = vsyncadd [#allocation3], 4294966272  ;;  %v24_v0 = vld [vmem:[#allocation2] sm:$0xff]  ;;  %v25_v1 = vld [vmem:[#allocation2 + $0x8] sm:$0xff]  ;;  %vm65_vm0 = vcmask 1041409   ;;  %vm68_vm1 = vcmask 1042434  }
   0x6   :  { %28 = vxpose.xlu0.b32.start [1/4] (short) (narrow) %v24_v0, 32  ;;  %v26_v2 = vld [vmem:[#allocation2 + $0x10] sm:$0xff]  ;;  %v27_v3 = vld [vmem:[#allocation2 + $0x18] sm:$0xff]  ;;  %vm71_vm2 = vcmask 1043459   ;;  %v1180_v60 = vld [vmem:[#allocation2 + $0x20] sm:$0xff]  ;;  %vm642_vm3 = vcmask 1044484  }
   0x7   :  { %v1181_v61 = vld [vmem:[#allocation2 + $0x28] sm:$0xff]  ;;  %v1182_v62 = vld [vmem:[#allocation2 + $0x30] sm:$0xff]  ;;  %v1183_v63 = vld [vmem:[#allocation2 + $0x38] sm:$0xff]  ;;  %vm644_vm4 = vcmask 1045509   ;;  %vm646_vm5 = vcmask 1046534   ;;  %vm648_vm6 = vcmask 1047559  }
   0x8   :  { %s2709_s0 = smov 4   ;;  %s2710_s13 = smov 12   ;;  %vm1143_vm7 = vcmask 31744   ;;  %vm1152_vm8 = vcmask 64512   ;;  %vm1161_vm9 = vcmask 97280   ;;  %vm1170_vm10 = vcmask 130048  }
   0xe   :  { %29 = vxpose.xlu0.b32.cont [2/4] (short) (narrow) %v25_v1, 32 }
  0x16   :  { %30 = vxpose.xlu0.b32.cont [3/4] (short) (narrow) %v26_v2, 32 }
  0x1e   :  { %31 = vxpose.xlu0.b32.end [4/4] (short) (narrow) %v27_v3, 32 }
  0xaa   :  { %v44_v4 = vpop.trf.xlu0 }
  0xab   :  { %v343_v6 = vrot.slane %v44_v4, 7  ;;  %v303_v8 = vrot.slane %v44_v4, 6  ;;  %v184_v20 = vrot.slane %v44_v4, 3  ;;  %v223_v22 = vrot.slane %v44_v4, 4 }
  0xac   :  { %v145_v38 = vrot.slane %v44_v4, 2  ;;  %v263_v41 = vrot.slane %v44_v4, 5  ;;  %v106_v46 = vrot.slane %v44_v4, 1 }
  0xb2   :  { %v45_v5 = vpop.trf.xlu0 }
  0xb3   :  { %v344_v7 = vrot.slane %v45_v5, 6  ;;  %v304_v9 = vrot.slane %v45_v5, 5  ;;  %v185_v15 = vrot.slane %v45_v5, 2  ;;  %v224_v17 = vrot.slane %v45_v5, 3 }
  0xb4   :  { %v64_v21 = vrot.slane %v45_v5, 7  ;;  %v146_v37 = vrot.slane %v45_v5, 1  ;;  %v264_v40 = vrot.slane %v45_v5, 4  ;;  %v107_v51 = vsel %vm65_vm0, %v45_v5, %v106_v46 }
  0xb5   :  { %v345_v10 = vsel %vm65_vm0, %v344_v7, %v343_v6  ;;  %v305_v11 = vsel %vm65_vm0, %v304_v9, %v303_v8  ;;  %v186_v25 = vsel %vm65_vm0, %v185_v15, %v184_v20  ;;  %v225_v28 = vsel %vm65_vm0, %v224_v17, %v223_v22 }
  0xb6   :  { %v66_v31 = vsel %vm65_vm0, %v64_v21, %v44_v4  ;;  %v147_v44 = vsel %vm65_vm0, %v146_v37, %v145_v38  ;;  %v265_v50 = vsel %vm65_vm0, %v264_v40, %v263_v41 }
  0xba   :  { %v46_v12 = vpop.trf.xlu0 }
  0xbb   :  { %v346_v13 = vrot.slane %v46_v12, 5  ;;  %v306_v14 = vrot.slane %v46_v12, 4  ;;  %v187_v16 = vrot.slane %v46_v12, 1  ;;  %v226_v23 = vrot.slane %v46_v12, 2 }
  0xbc   :  { %v67_v24 = vrot.slane %v46_v12, 6  ;;  %v266_v42 = vrot.slane %v46_v12, 3  ;;  %v108_v43 = vrot.slane %v46_v12, 7  ;;  %v148_v48 = vsel %vm68_vm1, %v46_v12, %v147_v44 }
  0xbd   :  { %v347_v18 = vsel %vm68_vm1, %v346_v13, %v345_v10  ;;  %v307_v19 = vsel %vm68_vm1, %v306_v14, %v305_v11  ;;  %v188_v27 = vsel %vm68_vm1, %v187_v16, %v186_v25  ;;  %v227_v33 = vsel %vm68_vm1, %v226_v23, %v225_v28 }
  0xbe   :  { %v69_v34 = vsel %vm68_vm1, %v67_v24, %v66_v31  ;;  %v267_v52 = vsel %vm68_vm1, %v266_v42, %v265_v50  ;;  %v109_v53 = vsel %vm68_vm1, %v108_v43, %v107_v51 }
  0xc2   :  { %v47_v26 = vpop.trf.xlu0 }
  0xc3   :  { %v189_v29 = vsel %vm71_vm2, %v47_v26, %v188_v27  ;;  %v228_v30 = vrot.slane %v47_v26, 1  ;;  %v70_v32 = vrot.slane %v47_v26, 5  ;;  %v149_v39 = vrot.slane %v47_v26, 7 }
  0xc4   :  { %191 = vxpose.xlu2.b32.start.end [1/1] (short) (narrow) %v189_v29, 32  ;;  %v268_v45 = vrot.slane %v47_v26, 2  ;;  %v110_v47 = vrot.slane %v47_v26, 6  ;;  %v348_v56 = vrot.slane %v47_v26, 4  ;;  %v308_v57 = vrot.slane %v47_v26, 3 }
  0xc5   :  { %v229_v35 = vsel %vm71_vm2, %v228_v30, %v227_v33  ;;  %v72_v36 = vsel %vm71_vm2, %v70_v32, %v69_v34  ;;  %v150_v49 = vsel %vm71_vm2, %v149_v39, %v148_v48 }
  0xc6   :  { %231 = vxpose.xlu0.b32.start.end [1/1] (short) (narrow) %v229_v35, 32  ;;  %74 = vxpose.xlu1.b32.start.end [1/1] (short) (narrow) %v72_v36, 32  ;;  %v269_v54 = vsel %vm71_vm2, %v268_v45, %v267_v52  ;;  %v111_v55 = vsel %vm71_vm2, %v110_v47, %v109_v53  ;;  %v349_v58 = vsel %vm71_vm2, %v348_v56, %v347_v18 }
  0xc7   :  { %v309_v59 = vsel %vm71_vm2, %v308_v57, %v307_v19 }
  0xe4   :  { %152 = vxpose.xlu2.b32.start.end [1/1] (short) (narrow) %v150_v49, 32 }
  0xe6   :  { %271 = vxpose.xlu0.b32.start.end [1/1] (short) (narrow) %v269_v54, 32  ;;  %113 = vxpose.xlu1.b32.start.end [1/1] (short) (narrow) %v111_v55, 32 }
 0x104   :  { %351 = vxpose.xlu2.b32.start.end [1/1] (short) (narrow) %v349_v58, 32 }
 0x106   :  { %311 = vxpose.xlu1.b32.start.end [1/1] (short) (narrow) %v309_v59, 32 }
 0x126   :  { %1184 = vxpose.xlu1.b32.start [1/4] (short) (narrow) %v1180_v60, 32 }
 0x12e   :  { %1185 = vxpose.xlu1.b32.cont [2/4] (short) (narrow) %v1181_v61, 32 }
 0x136   :  { %1186 = vxpose.xlu1.b32.cont [3/4] (short) (narrow) %v1182_v62, 32 }
 0x13e   :  { %1187 = vxpose.xlu1.b32.end [4/4] (short) (narrow) %v1183_v63, 32 }
 0x15d   :  { %v2749_v0 = vpop.trf.xlu2 }
 0x165   :  { %v2751_v1 = vpop.trf.xlu2 }
 0x166   :  { %v2374_v22 = vrot.slane %v2751_v1, 6  ;;  %v2392_v27 = vrot.slane %v2751_v1, 9  ;;  %v2403_v30 = vrot.slane %v2751_v1, 11  ;;  %v556_v41 = vrot.slane %v2751_v1, 5 }
 0x167   :  { %v2380_v51 = vrot.slane %v2751_v1, 7 }
 0x16a   :  { %v2753_v2 = vpop.trf.xlu1  ;;  %v2755_v3 = vpop.trf.xlu0 }
 0x16d   :  { %v2757_v4 = vpop.trf.xlu2 }
 0x16e   :  { %v2416_v50 = vrot.slane %v2757_v4, 6  ;;  %v2434_v54 = vrot.slane %v2757_v4, 9  ;;  %v2451_v21 = vrot.slane %v2757_v4, 12 }
 0x172   :  { %v2759_v5 = vpop.trf.xlu1  ;;  %v2761_v6 = vpop.trf.xlu0 }
 0x173   :  { %v4390_v15 = vrot.slane %v2761_v6, 4  ;;  %v416_v16 = vrot.slane %v2759_v5, 1  ;;  %v480_v17 = vrot.slane %v2759_v5, 3  ;;  %v512_v18 = vrot.slane %v2759_v5, 4 }
 0x174   :  { %v576_v19 = vrot.slane %v2759_v5, 6  ;;  %v448_v20 = vrot.slane %v2759_v5, 2  ;;  %v544_v23 = vrot.slane %v2759_v5, 5  ;;  %v2375_v25 = vrot.slane %v2761_v6, 5 }
 0x175   :  { %v2763_v7 = vpop.trf.xlu2  ;;  %v2387_v26 = vrot.slane %v2761_v6, 7  ;;  %v2794_v28 = vrot.slane %v4390_v15, 4  ;;  %v2404_v35 = vrot.slane %v2761_v6, 10  ;;  %v2381_v55 = vrot.slane %v2761_v6, 6 }
 0x17a   :  { %v2765_v8 = vpop.trf.xlu1  ;;  %v2767_v9 = vpop.trf.xlu0 }
 0x17b   :  { %v417_v31 = vrot.slane %v2765_v8, 1  ;;  %v513_v32 = vrot.slane %v2765_v8, 4  ;;  %v609_v33 = vrot.slane %v2765_v8, 7  ;;  %v4389_v46 = vrot.slane %v2767_v9, 4 }
 0x17d   :  { %v2769_v10 = vpop.trf.xlu2  ;;  %v2838_v63 = vrot.slane %v4389_v46, 4 }
 0x182   :  { %v2771_v11 = vpop.trf.xlu1  ;;  %v2773_v12 = vpop.trf.xlu0 }
 0x183   :  { %v450_v58 = vrot.slane %v2771_v11, 2 }
 0x185   :  { %v2777_v14 = vpop.trf.xlu2 }
 0x186   :  { %v2385_v39 = vrot.slane %v2777_v14, 9  ;;  %v584_v43 = vrot.slane %v2777_v14, 6  ;;  %v2391_v47 = vrot.slane %v2777_v14, 10  ;;  %v2373_v56 = vrot.slane %v2777_v14, 7 }
 0x188   :  { %v835_v62 = vrot.slane %v584_v43, 6 }
 0x18a   :  { %v2775_v13 = vpop.trf.xlu1  ;;  %v2796_v29 = vpop.trf.xlu0 }
 0x18d   :  { %v2818_v48 = vpop.trf.xlu2 }
 0x18e   :  { %v2415_v42 = vrot.slane %v2818_v48, 7  ;;  %v2433_v59 = vrot.slane %v2818_v48, 10 }
 0x192   :  { %v2802_v34 = vpop.trf.xlu1  ;;  %v2855_v38 = vpop.trf.xlu0 }
 0x193   :  { %v2384_v40 = vrot.slane %v2802_v34, 10  ;;  %v2390_v44 = vrot.slane %v2802_v34, 11  ;;  %v764_v45 = vsel %vm65_vm0, %v2802_v34, %v416_v16  ;;  %v2402_v52 = vrot.slane %v2802_v34, 13 }
 0x194   :  { %v2397_v16 = vrot.slane %v2777_v14, 11  ;;  %v612_v15 = vrot.slane %v2802_v34, 7 }
 0x195   :  { %v792_v49 = vsel %vm65_vm0, %v2384_v40, %v480_v17  ;;  %v806_v61 = vsel %vm65_vm0, %v2390_v44, %v512_v18  ;;  %v2845_v40 = vrot.slane %v556_v41, 5  ;;  %v834_v44 = vsel %vm65_vm0, %v2402_v52, %v576_v19 }
 0x196   :  { %v794_v57 = vsel %vm68_vm1, %v2385_v39, %v792_v49  ;;  %v808_v39 = vsel %vm68_vm1, %v2391_v47, %v806_v61  ;;  %v766_v61 = vsel %vm68_vm1, %v2373_v56, %v764_v45  ;;  %v836_v19 = vsel %vm68_vm1, %v835_v62, %v834_v44 }
 0x197   :  { %v796_v60 = vsel %vm71_vm2, %v2751_v1, %v794_v57  ;;  %v2850_v18 = vsel %vm71_vm2, %v2392_v27, %v808_v39  ;;  %v2398_v57 = vrot.slane %v2761_v6, 9  ;;  %v2378_v27 = vrot.slane %v2802_v34, 9 }
 0x198   :  { %v838_v36 = vsel %vm71_vm2, %v2403_v30, %v836_v19  ;;  %v2450_v56 = vrot.slane %v2818_v48, 13  ;;  %v768_v39 = vsel %vm71_vm2, %v2374_v22, %v766_v61  ;;  %v4392_v62 = vrot.slane %v2855_v38, 3  ;;  %v2881_v19 = vpop.trf.xlu2 }
 0x199   :  { %v778_v22 = vsel %vm65_vm0, %v2378_v27, %v448_v20  ;;  %v2409_v61 = vrot.slane %v2751_v1, 12  ;;  %v2481_v24 = vrot.slane %v2881_v19, 11 }
 0x19a   :  { %v2847_v49 = vpop.trf.xlu1  ;;  %v780_v52 = vsel %vm68_vm1, %v2777_v14, %v778_v22  ;;  %v799_v20 = vrot.slane %v4392_v62, 3  ;;  %v847_v22 = vrot.slane %v612_v15, 7 }
 0x19b   :  { %v4391_v46 = vrot.slane %v2847_v49, 7  ;;  %v2432_v47 = vrot.slane %v2847_v49, 11  ;;  %v893_v45 = vsel %vm65_vm0, %v2847_v49, %v417_v31  ;;  %v2376_v31 = vrot.slane %v2855_v38, 4 }
 0x19c   :  { %v782_v27 = vsel %vm71_vm2, %v2380_v51, %v780_v52  ;;  %v2393_v52 = vrot.slane %v2855_v38, 7 }
 0x19d   :  { %v976_v37 = vrot.slane %v4391_v46, 7  ;;  %v935_v44 = vsel %vm65_vm0, %v2432_v47, %v513_v32  ;;  %v2410_v32 = vrot.slane %v2761_v6, 11  ;;  %v770_v47 = vsel %vm642_vm3, %v2375_v25, %v768_v39 }
 0x19e   :  { %v2422_v25 = vrot.slane %v2757_v4, 7  ;;  %v2396_v39 = vrot.slane %v2802_v34, 12  ;;  %v2457_v46 = vrot.slane %v2881_v19, 7  ;;  %v2913_v62 = vsel %vm644_vm4, %v2376_v31, %v770_v47 }
 0x19f   :  { %v977_v30 = vsel %vm65_vm0, %v976_v37, %v609_v33  ;;  %v798_v33 = vsel %vm642_vm3, %v2387_v26, %v796_v60  ;;  %v2423_v37 = vrot.slane %v2767_v9, 6  ;;  %v784_v51 = vsel %vm642_vm3, %v2381_v55, %v782_v27 }
 0x1a0   :  { %v979_v53 = vsel %vm68_vm1, %v2450_v56, %v977_v30  ;;  %v895_v56 = vsel %vm68_vm1, %v2415_v42, %v893_v45  ;;  %v756_v26 = vsel %vm65_vm0, %v612_v15, %v2759_v5  ;;  %v2420_v60 = vrot.slane %v2847_v49, 9 }
 0x1a1   :  { %v2925_v30 = vsel %vm644_vm4, %v799_v20, %v798_v33  ;;  %v2405_v31 = vrot.slane %v2855_v38, 9  ;;  %v937_v47 = vsel %vm68_vm1, %v2433_v59, %v935_v44  ;;  %v2426_v55 = vrot.slane %v2847_v49, 10  ;;  %v2938_v20 = vpop.trf.xlu0 }
 0x1a2   :  { %v2898_v17 = vpop.trf.xlu1  ;;  %v2438_v27 = vrot.slane %v2847_v49, 12  ;;  %v757_v42 = vsel %vm68_vm1, %v584_v43, %v756_v26  ;;  %v820_v15 = vsel %vm65_vm0, %v2396_v39, %v544_v23  ;;  %v2444_v45 = vrot.slane %v2847_v49, 13  ;;  %v2950_v26 = vpop.trf.xlu2 }
 0x1a3   :  { %v2462_v34 = vrot.slane %v2898_v17, 9  ;;  %v897_v59 = vsel %vm71_vm2, %v2416_v50, %v895_v56  ;;  %v758_v44 = vsel %vm71_vm2, %v556_v41, %v757_v42  ;;  %v822_v43 = vsel %vm68_vm1, %v2397_v16, %v820_v15 }
 0x1a4   :  { %v2480_v33 = vrot.slane %v2898_v17, 12  ;;  %v939_v23 = vsel %vm71_vm2, %v2434_v54, %v937_v47  ;;  %v824_v39 = vsel %vm71_vm2, %v2845_v40, %v822_v43  ;;  %v812_v50 = vsel %vm642_vm3, %v2794_v28, %v2850_v18 }
 0x1a5   :  { %v1036_v1 = vsel %vm65_vm0, %v2462_v34, %v450_v58  ;;  %v840_v16 = vsel %vm642_vm3, %v2404_v35, %v838_v36  ;;  %v826_v54 = vsel %vm642_vm3, %v2398_v57, %v824_v39  ;;  %v2418_v58 = vrot.slane %v2938_v20, 4 }
 0x1a6   :  { %v1038_v40 = vsel %vm68_vm1, %v2881_v19, %v1036_v1  ;;  %v2435_v34 = vrot.slane %v2938_v20, 7  ;;  %v981_v56 = vsel %vm71_vm2, %v2451_v21, %v979_v53  ;;  %v4401_v28 = vrot.slane %v2759_v5, 7 }
 0x1a7   :  { %v4402_v35 = vrot.slane %v2767_v9, 5  ;;  %v941_v57 = vsel %vm642_vm3, %v2838_v63, %v939_v23  ;;  %v2382_v47 = vrot.slane %v2855_v38, 5  ;;  %v4403_v42 = vrot.slane %v2777_v14, 13 }
 0x1a8   :  { %v848_v18 = vsel %vm65_vm0, %v847_v22, %v4401_v28  ;;  %v2453_v43 = vrot.slane %v2938_v20, 10  ;;  %v4404_v5 = vrot.slane %v2847_v49, 7  ;;  %v4405_v22 = vrot.slane %v2771_v11, 5 }
 0x1a9   :  { %v899_v36 = vsel %vm642_vm3, %v4402_v35, %v897_v59  ;;  %v850_v15 = vsel %vm68_vm1, %v4403_v42, %v848_v18  ;;  %v4406_v63 = vrot.slane %v2767_v9, 11  ;;  %v4407_v14 = vrot.slane %v2761_v6, 4 }
 0x1aa   :  { %v2960_v41 = vpop.trf.xlu1  ;;  %v852_v21 = vsel %vm71_vm2, %v2409_v61, %v850_v15  ;;  %v885_v53 = vsel %vm65_vm0, %v4404_v5, %v2765_v8  ;;  %v1078_v59 = vsel %vm65_vm0, %v2480_v33, %v4405_v22  ;;  %v4408_v61 = vrot.slane %v2818_v48, 6 }
 0x1ab   :  { %v983_v23 = vsel %vm642_vm3, %v4406_v63, %v981_v56  ;;  %v759_v39 = vsel %vm642_vm3, %v4407_v14, %v758_v44  ;;  %v854_v1 = vsel %vm642_vm3, %v2410_v32, %v852_v21  ;;  %v814_v18 = vsel %vm644_vm4, %v2393_v52, %v812_v50 }
 0x1ac   :  { %v886_v28 = vsel %vm68_vm1, %v4408_v61, %v885_v53  ;;  %v842_v35 = vsel %vm644_vm4, %v2405_v31, %v840_v16  ;;  %v901_v33 = vsel %vm644_vm4, %v2418_v58, %v899_v36  ;;  %v1080_v42 = vsel %vm68_vm1, %v2481_v24, %v1078_v59 }
 0x1ad   :  { %v614_v56 = vrot.slane %v2898_v17, 7  ;;  %v943_v6 = vsel %vm644_vm4, %v2435_v34, %v941_v57  ;;  %v786_v44 = vsel %vm644_vm4, %v2382_v47, %v784_v51  ;;  %v4409_v32 = vrot.slane %v2765_v8, 2  ;;  %v3034_v47 = vpop.trf.xlu2 }
 0x1ae   :  { %v985_v21 = vsel %vm644_vm4, %v2453_v43, %v983_v23  ;;  %v4410_v52 = vrot.slane %v2855_v38, 3  ;;  %v2464_v50 = vrot.slane %v2763_v7, 7  ;;  %v2465_v58 = vrot.slane %v2773_v12, 6 }
 0x1af   :  { %v907_v15 = vsel %vm65_vm0, %v2420_v60, %v4409_v32  ;;  %v2411_v51 = vrot.slane %v2855_v38, 10  ;;  %v4411_v34 = vrot.slane %v2757_v4, 5  ;;  %v4412_v36 = vrot.slane %v2765_v8, 3 }
 0x1b0   :  { %v760_v31 = vsel %vm644_vm4, %v4410_v52, %v759_v39  ;;  %v909_v24 = vsel %vm68_vm1, %v2818_v48, %v907_v15  ;;  %v828_v63 = vsel %vm644_vm4, %v2855_v38, %v826_v54  ;;  %v501_v38 = vrot.slane %v2938_v20, 3  ;;  %v3059_v52 = vpop.trf.xlu0 }
 0x1b1   :  { %v887_v60 = vsel %vm71_vm2, %v4411_v34, %v886_v28  ;;  %v921_v57 = vsel %vm65_vm0, %v2426_v55, %v4412_v36  ;;  %v4413_v28 = vrot.slane %v2763_v7, 5  ;;  %v856_v15 = vsel %vm644_vm4, %v2411_v51, %v854_v1 }
 0x1b2   :  { %v328_v16 = vpop.trf.xlu1  ;;  %v4414_v54 = vrot.slane %v2767_v9, 4  ;;  %v911_v1 = vsel %vm71_vm2, %v2422_v25, %v909_v24  ;;  %v1040_v34 = vsel %vm71_vm2, %v2464_v50, %v1038_v40  ;;  %v2482_v36 = vrot.slane %v2773_v12, 9 }
 0x1b3   :  { %v2377_v43 = vrot.slane %v328_v16, 3  ;;  %v2388_v5 = vrot.slane %v328_v16, 5  ;;  %v2394_v53 = vrot.slane %v328_v16, 6  ;;  %v3037_v22 = vsel %vm646_vm5, %v328_v16, %v842_v35 }
 0x1b4   :  { %v472_v59 = vrot.slane %v328_v16, 2  ;;  %v2400_v23 = vrot.slane %v328_v16, 7  ;;  %v2412_v14 = vrot.slane %v328_v16, 9  ;;  %v1081_v35 = vrot.slane %v4413_v28, 5 }
 0x1b5   :  { %v3043_v39 = vsel %vm646_vm5, %v2377_v43, %v2913_v62  ;;  %v3047_v55 = vsel %vm646_vm5, %v2388_v5, %v2925_v30  ;;  %v3050_v61 = vsel %vm646_vm5, %v2394_v53, %v814_v18  ;;  %v888_v62 = vsel %vm642_vm3, %v4414_v54, %v887_v60  ;;  %v3101_v54 = vpop.trf.xlu2 }
 0x1b6   :  { %v787_v32 = vrot.slane %v472_v59, 2  ;;  %v3062_v30 = vsel %vm646_vm5, %v472_v59, %v760_v31  ;;  %v3065_v18 = vsel %vm646_vm5, %v2400_v23, %v828_v63  ;;  %v858_v16 = vsel %vm646_vm5, %v2412_v14, %v856_v15 }
 0x1b7   :  { %v2466_v60 = vrot.slane %v3059_v52, 5  ;;  %v3079_v31 = vsel %vm648_vm6, %v3034_v47, %v858_v16  ;;  %v889_v43 = vsel %vm644_vm4, %v501_v38, %v888_v62  ;;  %v1082_v5 = vsel %vm71_vm2, %v1081_v35, %v1080_v42 }
 0x1b8   :  { %v3072_v51 = vsel %vm646_vm5, %v787_v32, %v786_v44  ;;  %v2424_v53 = vrot.slane %v2938_v20, 5  ;;  %v913_v44 = vsel %vm642_vm3, %v2423_v37, %v911_v1  ;;  %v4415_v40 = vrot.slane %v2818_v48, 9 }
 0x1b9   :  { %v2429_v24 = vrot.slane %v2767_v9, 7  ;;  %v4416_v59 = vrot.slane %v2765_v8, 5  ;;  %v928_v37 = vrot.slane %v501_v38, 3  ;;  %v4417_v15 = vrot.slane %v2818_v48, 11 }
 0x1ba   :  { %v329_v25 = vpop.trf.xlu1  ;;  %v923_v50 = vsel %vm68_vm1, %v4415_v40, %v921_v57  ;;  %v1042_v38 = vsel %vm642_vm3, %v2465_v58, %v1040_v34  ;;  %v1084_v40 = vsel %vm642_vm3, %v2482_v36, %v1082_v5  ;;  %v4419_v58 = vrot.slane %v2765_v8, 6 }
 0x1bb   :  { %v949_v63 = vsel %vm65_vm0, %v2438_v27, %v4416_v59  ;;  %v2419_v42 = vrot.slane %v329_v25, 3  ;;  %v2436_v23 = vrot.slane %v329_v25, 6  ;;  %v2454_v14 = vrot.slane %v329_v25, 9 }
 0x1bc   :  { %v473_v28 = vrot.slane %v329_v25, 2  ;;  %v925_v35 = vsel %vm71_vm2, %v2757_v4, %v923_v50  ;;  %v2430_v32 = vrot.slane %v329_v25, 5  ;;  %v951_v57 = vsel %vm68_vm1, %v4417_v15, %v949_v63 }
 0x1bd   :  { %v3104_v62 = vsel %vm646_vm5, %v2419_v42, %v901_v33  ;;  %v3107_v27 = vsel %vm646_vm5, %v2436_v23, %v943_v6  ;;  %v3110_v16 = vsel %vm646_vm5, %v2454_v14, %v985_v21  ;;  %v915_v50 = vsel %vm644_vm4, %v2424_v53, %v913_v44 }
 0x1be   :  { %v3113_v1 = vsel %vm646_vm5, %v473_v28, %v889_v43  ;;  %v2431_v59 = vrot.slane %v3101_v54, 4  ;;  %v916_v63 = vrot.slane %v473_v28, 2  ;;  %v927_v33 = vsel %vm642_vm3, %v2429_v24, %v925_v35 }
 0x1bf   :  { %v4418_v6 = vrot.slane %v2757_v4, 5  ;;  %v2440_v21 = vrot.slane %v2767_v9, 9  ;;  %v929_v23 = vsel %vm644_vm4, %v928_v37, %v927_v33  ;;  %v2442_v43 = vrot.slane %v329_v25, 7 }
 0x1c0   :  { %v2443_v14 = vrot.slane %v3101_v54, 6  ;;  %v963_v34 = vsel %vm65_vm0, %v2444_v45, %v4419_v58  ;;  %v3131_v36 = vsel %vm646_vm5, %v916_v63, %v915_v50  ;;  %v931_v5 = vsel %vm646_vm5, %v2430_v32, %v929_v23 }
 0x1c1   :  { %v952_v42 = vrot.slane %v4418_v6, 5  ;;  %v4420_v44 = vrot.slane %v2818_v48, 6  ;;  %v1086_v35 = vsel %vm644_vm4, %v3059_v52, %v1084_v40  ;;  %v3142_v8 = vsel %vm648_vm6, %v2431_v59, %v931_v5 }
 0x1c2   :  { %v3137_v28 = vpop.trf.xlu1  ;;  %v2445_v45 = vrot.slane %v2757_v4, 11  ;;  %v2446_v50 = vrot.slane %v2767_v9, 10  ;;  %v2447_v59 = vrot.slane %v2938_v20, 9  ;;  %v2449_v6 = vrot.slane %v3101_v54, 7 }
 0x1c3   :  { %v953_v53 = vsel %vm71_vm2, %v952_v42, %v951_v57  ;;  %v964_v24 = vrot.slane %v4420_v44, 6  ;;  %v474_v37 = vrot.slane %v3137_v28, 2  ;;  %v2484_v32 = vrot.slane %v3137_v28, 7 }
 0x1c4   :  { %v955_v49 = vsel %vm642_vm3, %v2440_v21, %v953_v53  ;;  %v586_v42 = vrot.slane %v2881_v19, 6  ;;  %v2468_v21 = vrot.slane %v2898_v17, 10  ;;  %v1044_v23 = vsel %vm644_vm4, %v2466_v60, %v1042_v38 }
 0x1c5   :  { %v957_v48 = vsel %vm644_vm4, %v2938_v20, %v955_v49  ;;  %v965_v15 = vsel %vm68_vm1, %v964_v24, %v963_v34  ;;  %v1045_v63 = vrot.slane %v474_v37, 2  ;;  %v3156_v4 = vsel %vm646_vm5, %v2484_v32, %v1086_v35 }
 0x1c6   :  { %v959_v57 = vsel %vm646_vm5, %v2442_v43, %v957_v48  ;;  %v967_v40 = vsel %vm71_vm2, %v2445_v45, %v965_v15  ;;  %v4421_v58 = vrot.slane %v2771_v11, 1  ;;  %v530_v60 = vrot.slane %v2773_v12, 4 }
 0x1c7   :  { %v3159_v33 = vsel %vm648_vm6, %v2443_v14, %v959_v57  ;;  %v969_v43 = vsel %vm642_vm3, %v2446_v50, %v967_v40  ;;  %v3167_v9 = vsel %vm646_vm5, %v1045_v63, %v1044_v23  ;;  %v1014_v14 = vsel %vm65_vm0, %v614_v56, %v2771_v11 }
 0x1c8   :  { %v971_v20 = vsel %vm644_vm4, %v2447_v59, %v969_v43  ;;  %v1022_v34 = vsel %vm65_vm0, %v2898_v17, %v4421_v58  ;;  %v1015_v38 = vsel %vm68_vm1, %v586_v42, %v1014_v14  ;;  %v482_v53 = vrot.slane %v2771_v11, 3 }
 0x1c9   :  { %v973_v5 = vsel %vm646_vm5, %v329_v25, %v971_v20  ;;  %v4422_v24 = vrot.slane %v2763_v7, 5  ;;  %v1024_v49 = vsel %vm68_vm1, %v2457_v46, %v1022_v34  ;;  %v2458_v45 = vrot.slane %v2763_v7, 6 }
 0x1ca   :  { %v3183_v44 = vsel %vm648_vm6, %v2449_v6, %v973_v5  ;;  %v2469_v25 = vrot.slane %v2881_v19, 9  ;;  %v3193_v32 = vpop.trf.xlu1  ;;  %v502_v48 = vrot.slane %v3059_v52, 3  ;;  %v2459_v57 = vrot.slane %v2773_v12, 5 }
 0x1cb   :  { %v1016_v35 = vsel %vm71_vm2, %v4422_v24, %v1015_v38  ;;  %v2460_v40 = vrot.slane %v3059_v52, 4  ;;  %v1050_v50 = vsel %vm65_vm0, %v2468_v21, %v482_v53  ;;  %v2474_v59 = vrot.slane %v2898_v17, 11 }
 0x1cc   :  { %v1017_v15 = vsel %vm642_vm3, %v530_v60, %v1016_v35  ;;  %v2475_v63 = vrot.slane %v2881_v19, 10  ;;  %v1026_v23 = vsel %vm71_vm2, %v2458_v45, %v1024_v49  ;;  %v2461_v43 = vrot.slane %v3137_v28, 3 }
 0x1cd   :  { %v1018_v46 = vsel %vm644_vm4, %v502_v48, %v1017_v15  ;;  %v1028_v20 = vsel %vm642_vm3, %v2459_v57, %v1026_v23  ;;  %v1052_v14 = vsel %vm68_vm1, %v2469_v25, %v1050_v50  ;;  %v2471_v58 = vrot.slane %v2773_v12, 7 }
 0x1ce   :  { %v3204_v6 = vsel %vm646_vm5, %v474_v37, %v1018_v46  ;;  %v514_v21 = vrot.slane %v2771_v11, 4  ;;  %v1030_v34 = vsel %vm644_vm4, %v2460_v40, %v1028_v20  ;;  %v1054_v5 = vsel %vm71_vm2, %v2763_v7, %v1052_v14 }
 0x1cf   :  { %v1057_v38 = vrot.slane %v502_v48, 3  ;;  %v2472_v37 = vrot.slane %v3137_v28, 5  ;;  %v3217_v53 = vsel %vm646_vm5, %v2461_v43, %v1030_v34  ;;  %v1056_v24 = vsel %vm642_vm3, %v2471_v58, %v1054_v5 }
 0x1d0   :  { %v1064_v35 = vsel %vm65_vm0, %v2474_v59, %v514_v21  ;;  %v2486_v48 = vrot.slane %v2898_v17, 13  ;;  %v1456_v57 = vrot.slane %v3193_v32, 6  ;;  %v2476_v40 = vrot.slane %v2763_v7, 9 }
 0x1d1   :  { %v1058_v49 = vsel %vm644_vm4, %v1057_v38, %v1056_v24  ;;  %v1066_v45 = vsel %vm68_vm1, %v2475_v63, %v1064_v35  ;;  %v1376_v46 = vrot.slane %v3193_v32, 4  ;;  %v1069_v23 = vrot.slane %v530_v60, 4 }
 0x1d2   :  { %v3223_v25 = vpop.trf.xlu1  ;;  %v3226_v15 = vsel %vm646_vm5, %v2472_v37, %v1058_v49  ;;  %v2477_v63 = vrot.slane %v3059_v52, 7  ;;  %v578_v43 = vrot.slane %v2771_v11, 6  ;;  %v1068_v58 = vsel %vm71_vm2, %v2476_v40, %v1066_v45 }
 0x1d3   :  { %v1457_v50 = vrot.slane %v3223_v25, 5  ;;  %v1377_v59 = vrot.slane %v3223_v25, 3  ;;  %v2478_v21 = vrot.slane %v3137_v28, 6  ;;  %v1070_v5 = vsel %vm642_vm3, %v1069_v23, %v1068_v58 }
 0x1d4   :  { %v1092_v34 = vsel %vm65_vm0, %v2486_v48, %v578_v43  ;;  %v1093_v38 = vrot.slane %v586_v42, 6  ;;  %v1072_v37 = vsel %vm644_vm4, %v2477_v63, %v1070_v5  ;;  %v1105_v49 = vrot.slane %v614_v56, 7 }
 0x1d5   :  { %v1458_v20 = vsel %vm65_vm0, %v1457_v50, %v1456_v57  ;;  %v1378_v14 = vsel %vm65_vm0, %v1377_v59, %v1376_v46  ;;  %v3246_v24 = vsel %vm646_vm5, %v2478_v21, %v1072_v37  ;;  %v2492_v45 = vrot.slane %v2881_v19, 13 }
 0x1d6   :  { %v1094_v35 = vsel %vm68_vm1, %v1093_v38, %v1092_v34  ;;  %v610_v42 = vrot.slane %v2771_v11, 7  ;;  %v1417_v40 = vrot.slane %v3223_v25, 4  ;;  %v1416_v59 = vrot.slane %v3193_v32, 5 }
 0x1d7   :  { %v1259_v17 = vrot.slane %v3193_v32, 1  ;;  %v1220_v19 = vrot.slane %v3223_v25, 7 }
 0x1d8   :  { %v1106_v56 = vsel %vm65_vm0, %v1105_v49, %v610_v42 }
 0x1d9   :  { %v1108_v43 = vsel %vm68_vm1, %v2492_v45, %v1106_v56  ;;  %v1260_v58 = vsel %vm65_vm0, %v3223_v25, %v1259_v17  ;;  %v1221_v5 = vsel %vm65_vm0, %v1220_v19, %v3193_v32  ;;  %v2489_v19 = vrot.slane %v3059_v52, 9 }
 0x1da   :  { %v3243_v60 = vpop.trf.xlu1 }
 0x1db   :  { %v1459_v57 = vrot.slane %v3243_v60, 4  ;;  %v1379_v48 = vrot.slane %v3243_v60, 2  ;;  %v1419_v23 = vrot.slane %v3243_v60, 3  ;;  %v1261_v11 = vrot.slane %v3243_v60, 7 }
 0x1dc   :  { %v1222_v63 = vrot.slane %v3243_v60, 6 }
 0x1dd   :  { %v3257_v50 = vsel %vm68_vm1, %v1459_v57, %v1458_v20  ;;  %v3260_v46 = vsel %vm68_vm1, %v1379_v48, %v1378_v14  ;;  %v1418_v14 = vsel %vm65_vm0, %v1417_v40, %v1416_v59  ;;  %v1262_v49 = vsel %vm68_vm1, %v1261_v11, %v1260_v58 }
 0x1de   :  { %v1420_v37 = vsel %vm68_vm1, %v1419_v23, %v1418_v14  ;;  %v1223_v57 = vsel %vm68_vm1, %v1222_v63, %v1221_v5  ;;  %v2487_v40 = vrot.slane %v2763_v7, 11  ;;  %v2488_v59 = vrot.slane %v2773_v12, 10 }
 0x1df   :  { %v2493_v23 = vrot.slane %v2763_v7, 12  ;;  %v2494_v14 = vrot.slane %v2773_v12, 11  ;;  %v1340_v12 = vrot.slane %v3243_v60, 1 }
 0x1e0   :  { %v1096_v17 = vsel %vm71_vm2, %v2487_v40, %v1094_v35 }
 0x1e1   :  { %v1098_v56 = vsel %vm642_vm3, %v2488_v59, %v1096_v17  ;;  %v1110_v58 = vsel %vm71_vm2, %v2493_v23, %v1108_v43  ;;  %v1299_v43 = vrot.slane %v3223_v25, 1 }
 0x1e2   :  { %v1203_v20 = vpop.trf.xlu1  ;;  %v1100_v11 = vsel %vm644_vm4, %v2489_v19, %v1098_v56  ;;  %v1112_v35 = vsel %vm642_vm3, %v2494_v14, %v1110_v58 }
 0x1e3   :  { %v1421_v21 = vrot.slane %v1203_v20, 2  ;;  %v1263_v34 = vrot.slane %v1203_v20, 6  ;;  %v1224_v38 = vrot.slane %v1203_v20, 5  ;;  %v3290_v63 = vsel %vm646_vm5, %v3137_v28, %v1100_v11 }
 0x1e4   :  { %v1461_v11 = vrot.slane %v1203_v20, 3  ;;  %v1381_v14 = vrot.slane %v1203_v20, 1 }
 0x1e5   :  { %v1422_v45 = vsel %vm71_vm2, %v1421_v21, %v1420_v37  ;;  %v1264_v48 = vsel %vm71_vm2, %v1263_v34, %v1262_v49  ;;  %v1225_v42 = vsel %vm71_vm2, %v1224_v38, %v1223_v57  ;;  %v2495_v21 = vrot.slane %v3059_v52, 10 }
 0x1e6   :  { %1424 = vxpose.xlu1.b32.start.end [1/1] (short) (narrow) %v1422_v45, 32  ;;  %1266 = vxpose.xlu2.b32.start.end [1/1] (short) (narrow) %v1264_v48, 32  ;;  %v2496_v34 = vrot.slane %v3137_v28, 9  ;;  %v1497_v38 = vrot.slane %v3223_v25, 6  ;;  %v1338_v37 = vrot.slane %v3223_v25, 2  ;;  %v1499_v49 = vrot.slane %v3243_v60, 5 }
 0x1e7   :  { %1227 = vxpose.xlu0.b32.start.end [1/1] (short) (narrow) %v1225_v42, 32  ;;  %v1114_v5 = vsel %vm644_vm4, %v2495_v21, %v1112_v35  ;;  %v1496_v52 = vrot.slane %v3193_v32, 7  ;;  %v1501_v57 = vrot.slane %v1203_v20, 4  ;;  %v1337_v28 = vrot.slane %v3193_v32, 3 }
 0x1e8   :  { %v3299_v7 = vsel %vm646_vm5, %v2496_v34, %v1114_v5  ;;  %v1298_v45 = vrot.slane %v3193_v32, 2  ;;  %v1302_v48 = vrot.slane %v1203_v20, 7  ;;  %v1462_v58 = vsel %vm71_vm2, %v1461_v11, %v3257_v50  ;;  %v3324_v5 = vpop.trf.xlu2 }
 0x1e9   :  { %v1498_v42 = vsel %vm65_vm0, %v1497_v38, %v1496_v52  ;;  %v1339_v40 = vsel %vm65_vm0, %v1338_v37, %v1337_v28  ;;  %v1382_v21 = vsel %vm71_vm2, %v1381_v14, %v3260_v46  ;;  %v444_v35 = vrot.slane %v3034_v47, 1 }
 0x1ea   :  { %v1500_v59 = vsel %vm68_vm1, %v1499_v49, %v1498_v42  ;;  %v1341_v17 = vsel %vm68_vm1, %v1340_v12, %v1339_v40  ;;  %v1300_v19 = vsel %vm65_vm0, %v1299_v43, %v1298_v45  ;;  %v2395_v46 = vrot.slane %v3034_v47, 5 }
 0x1eb   :  { %v1502_v25 = vsel %vm71_vm2, %v1501_v57, %v1500_v59  ;;  %v1342_v56 = vsel %vm71_vm2, %v1203_v20, %v1341_v17  ;;  %v1301_v23 = vsel %vm68_vm1, %v3243_v60, %v1300_v19  ;;  %v775_v34 = vrot.slane %v444_v35, 1 }
 0x1ec   :  { %v1303_v32 = vsel %vm71_vm2, %v1302_v48, %v1301_v23  ;;  %v2389_v20 = vrot.slane %v3034_v47, 4  ;;  %v818_v37 = vsel %vm648_vm6, %v2395_v46, %v3050_v61  ;;  %v2407_v12 = vrot.slane %v3034_v47, 7 }
 0x1ed   :  { %v776_v60 = vsel %vm648_vm6, %v775_v34, %v3043_v39  ;;  %v445_v43 = vrot.slane %v3101_v54, 1  ;;  %v2401_v23 = vrot.slane %v3034_v47, 6  ;;  %v2467_v11 = vrot.slane %v3324_v5, 3 }
 0x1ee   :  { %v804_v50 = vsel %vm648_vm6, %v2389_v20, %v3047_v55  ;;  %v846_v55 = vsel %vm648_vm6, %v2407_v12, %v3037_v22  ;;  %v2437_v22 = vrot.slane %v3101_v54, 5 }
 0x1ef   :  { %v904_v61 = vrot.slane %v445_v43, 1  ;;  %v891_v46 = vsel %vm648_vm6, %v445_v43, %v3113_v1 }
 0x1f0   :  { %v947_v40 = vsel %vm648_vm6, %v2437_v22, %v3107_v27  ;;  %v2346_v22 = vrot.slane %v2960_v41, 5 }
 0x1f1   :  { %v905_v28 = vsel %vm648_vm6, %v904_v61, %v3104_v62  ;;  %v2383_v62 = vrot.slane %v3034_v47, 3  ;;  %v1048_v47 = vsel %vm648_vm6, %v2467_v11, %v3167_v9  ;;  %v4393_v9 = vrot.slane %v2796_v29, 3 }
 0x1f2   :  { %v2347_v11 = vrot.slane %v2950_v26, 4 }
 0x1f3   :  { %v686_v1 = vrot.slane %v4393_v9, 3 }
 0x206   :  { %1504 = vxpose.xlu1.b32.start.end [1/1] (short) (narrow) %v1502_v25, 32  ;;  %1344 = vxpose.xlu2.b32.start.end [1/1] (short) (narrow) %v1342_v56, 32  ;;  %v790_v25 = vsel %vm648_vm6, %v2383_v62, %v3072_v51  ;;  %v989_v56 = vsel %vm648_vm6, %v3101_v54, %v3110_v16  ;;  %v762_v51 = vsel %vm648_vm6, %v444_v35, %v3062_v30 }
 0x207   :  { %1305 = vxpose.xlu0.b32.start.end [1/1] (short) (narrow) %v1303_v32, 32  ;;  %v832_v16 = vsel %vm648_vm6, %v2401_v23, %v3065_v18  ;;  %v2485_v18 = vrot.slane %v3324_v5, 6 }
 0x209   :  { %v1090_v12 = vsel %vm648_vm6, %v2485_v18, %v3156_v4 }
 0x226   :  { %1464 = vxpose.xlu2.b32.start.end [1/1] (short) (narrow) %v1462_v58, 32  ;;  %v2342_v58 = vrot.slane %v2775_v13, 10 }
 0x227   :  { %1384 = vxpose.xlu0.b32.start.end [1/1] (short) (narrow) %v1382_v21, 32  ;;  %v479_v21 = vrot.slane %v2753_v2, 3 }
 0x229   :  { %v679_v30 = vsel %vm65_vm0, %v2342_v58, %v479_v21 }
 0x278   :  { %863 = vrot.lane.b32.xlu1 %v776_v60, %s2709_s0  ;;  %v2343_v60 = vrot.slane %v2769_v10, 9 }
 0x27a   :  { %v681_v20 = vsel %vm68_vm1, %v2343_v60, %v679_v30 }
 0x27b   :  { %v683_v61 = vsel %vm71_vm2, %v2749_v0, %v681_v20 }
 0x27f   :  { %v3332_v38 = vpop.trf.xlu2 }
 0x280   :  { %4423 = vst [vmem:[#allocation5_spill] sm:$0xff] %v3332_v38  ;;  %867 = vrot.lane.b32.xlu1 %v804_v50, %s2709_s0 }
 0x287   :  { %v3338_v49 = vpop.trf.xlu2 }
 0x288   :  { %869 = vrot.lane.b32.xlu1 %v818_v37, %s2709_s0  ;;  %v2345_v37 = vrot.slane %v2755_v3, 7 }
 0x28a   :  { %v3356_v48 = vpop.trf.xlu1  ;;  %v685_v43 = vsel %vm642_vm3, %v2345_v37, %v683_v61  ;;  %v2558_v37 = vrot.slane %v3338_v49, 11  ;;  %v2570_v61 = vrot.slane %v3338_v49, 13 }
 0x28b   :  { %v3341_v39 = vpop.trf.xlu0  ;;  %4424 = vst [vmem:[#allocation6_spill] sm:$0xff] %v3356_v48  ;;  %v687_v23 = vsel %vm644_vm4, %v686_v1, %v685_v43 }
 0x28c   :  { %v689_v58 = vsel %vm646_vm5, %v2346_v22, %v687_v23 }
 0x28f   :  { %v3347_v52 = vpop.trf.xlu2 }
 0x290   :  { %873 = vrot.lane.b32.xlu1 %v846_v55, %s2709_s0  ;;  %v4394_v18 = vrot.slane %v3347_v52, 7 }
 0x292   :  { %v3367_v17 = vpop.trf.xlu1 }
 0x293   :  { %v3350_v57 = vpop.trf.xlu0 }
 0x294   :  { %v1633_v21 = vrot.slane %v3350_v57, 3 }
 0x297   :  { %v3354_v45 = vpop.trf.xlu2 }
 0x298   :  { %992 = vrot.lane.b32.xlu1 %v905_v28, %s2708_s12  ;;  %v446_v28 = vrot.slane %v3324_v5, 1 }
 0x29a   :  { %v3385_v14 = vpop.trf.xlu1  ;;  %v1033_v62 = vrot.slane %v446_v28, 1 }
 0x29b   :  { %v3359_v42 = vpop.trf.xlu0 }
 0x29c   :  { %v3450_v60 = vsel %vm648_vm6, %v1033_v62, %v3217_v53  ;;  %v2546_v53 = vrot.slane %v3338_v49, 9  ;;  %v3494_v62 = vrot.slane %v4394_v18, 7 }
 0x29f   :  { %v3364_v59 = vpop.trf.xlu2 }
 0x2a0   :  { %998 = vrot.lane.b32.xlu1 %v947_v40, %s2708_s12 }
 0x2a2   :  { %v3408_v50 = vpop.trf.xlu1 }
 0x2a3   :  { %v3370_v19 = vpop.trf.xlu0 }
 0x2a7   :  { %865 = vrot.lane.b32.xlu2 %v790_v25, %s2709_s0  ;;  %v3378_v27 = vpop.trf.xlu2  ;;  %v2473_v25 = vrot.slane %v3324_v5, 4 }
 0x2a8   :  { %1004 = vrot.lane.b32.xlu1 %v989_v56, %s2708_s12  ;;  %v2552_v56 = vrot.slane %v3338_v49, 10 }
 0x2a9   :  { %v3454_v30 = vsel %vm648_vm6, %v2473_v25, %v3226_v15  ;;  %v1569_v25 = vrot.slane %v3350_v57, 1 }
 0x2ab   :  { %v3382_v32 = vpop.trf.xlu0 }
 0x2ad   :  { %861 = vrot.lane.b32.xlu0 %v762_v51, %s2709_s0  ;;  %v2491_v51 = vrot.slane %v3324_v5, 7 }
 0x2af   :  { %871 = vrot.lane.b32.xlu2 %v832_v16, %s2709_s0  ;;  %v3397_v34 = vpop.trf.xlu2  ;;  %v1765_v16 = vrot.slane %v3338_v49, 7  ;;  %v3471_v15 = vsel %vm648_vm6, %v2491_v51, %v3290_v63 }
 0x2b0   :  { %1123 = vrot.lane.b32.xlu1 %v1048_v47, %s2710_s13  ;;  %v1020_v47 = vsel %vm648_vm6, %v446_v28, %v3204_v6  ;;  %v3465_v6 = vsel %vm648_vm6, %v2347_v11, %v689_v58  ;;  %v1601_v28 = vrot.slane %v3350_v57, 2  ;;  %v2548_v58 = vrot.slane %v3378_v27, 7 }
 0x2b1   :  { %v1905_v1 = vsel %vm65_vm0, %v1765_v16, %v3350_v57  ;;  %v3485_v43 = vrot.slane %v1765_v16, 7  ;;  %v1729_v16 = vrot.slane %v3350_v57, 6 }
 0x2b2   :  { %v1927_v51 = vsel %vm65_vm0, %v2546_v53, %v1601_v28 }
 0x2b3   :  { %v3402_v35 = vpop.trf.xlu0 }
 0x2b4   :  { %v1737_v9 = vrot.slane %v3402_v35, 6  ;;  %v2553_v23 = vrot.slane %v3402_v35, 9  ;;  %v1929_v11 = vsel %vm68_vm1, %v3402_v35, %v1927_v51  ;;  %v2541_v53 = vrot.slane %v3402_v35, 7 }
 0x2b5   :  { %875 = vrot.lane.b32.xlu0 %v3079_v31, %s2709_s0  ;;  %v2425_v31 = vrot.slane %v3101_v54, 3  ;;  %v2479_v54 = vrot.slane %v3324_v5, 5  ;;  %v2559_v28 = vrot.slane %v3402_v35, 10  ;;  %v1931_v63 = vsel %vm71_vm2, %v2548_v58, %v1929_v11 }
 0x2b7   :  { %990 = vrot.lane.b32.xlu2 %v891_v46, %s2708_s12  ;;  %v3417_v55 = vpop.trf.xlu2  ;;  %v919_v4 = vsel %vm648_vm6, %v2425_v31, %v3131_v36  ;;  %v3443_v36 = vpop.trf.xlu1  ;;  %v1941_v46 = vsel %vm65_vm0, %v2552_v56, %v1633_v21  ;;  %v1984_v21 = vrot.slane %v1737_v9, 6 }
 0x2b8   :  { %1129 = vrot.lane.b32.xlu1 %v1090_v12, %s2710_s13  ;;  %4425 = vst [vmem:[#allocation7_spill] sm:$0xff] %v3443_v36  ;;  %v3476_v12 = vsel %vm648_vm6, %v3324_v5, %v3299_v7  ;;  %v1943_v18 = vsel %vm68_vm1, %v2553_v23, %v1941_v46  ;;  %v2542_v7 = vrot.slane %v3378_v27, 6  ;;  %v4428_v23 = vrot.slane %v3367_v17, 3 }
 0x2bb   :  { %v3428_v40 = vpop.trf.xlu0 }
 0x2bd   :  { %994 = vrot.lane.b32.xlu0 %v919_v4, %s2708_s12 }
 0x2bf   :  { %996 = vrot.lane.b32.xlu2 %v3142_v8, %s2708_s12  ;;  %v3457_v20 = vpop.trf.xlu2  ;;  %v3461_v8 = vsel %vm648_vm6, %v2479_v54, %v3246_v24  ;;  %v2564_v24 = vrot.slane %v3338_v49, 12  ;;  %v3518_v56 = vpop.trf.xlu1  ;;  %v2550_v54 = vrot.slane %v3367_v17, 5 }
 0x2c0   :  { %4426 = vst [vmem:[#allocation8_spill] sm:$0xff] %v3457_v20  ;;  %v4396_v51 = vrot.slane %v3518_v56, 1  ;;  %v2560_v20 = vrot.slane %v3378_v27, 9 }
 0x2c3   :  { %v3480_v31 = vpop.trf.xlu0 }
 0x2c5   :  { %1000 = vrot.lane.b32.xlu0 %v3159_v33, %s2708_s12  ;;  %v1913_v33 = vsel %vm65_vm0, %v3338_v49, %v1569_v25  ;;  %v1983_v49 = vsel %vm65_vm0, %v2570_v61, %v1729_v16  ;;  %v1665_v61 = vrot.slane %v3350_v57, 4  ;;  %v1697_v25 = vrot.slane %v3350_v57, 5 }
 0x2c6   :  { %v1709_v16 = vrot.slane %v3378_v27, 5  ;;  %v1915_v46 = vsel %vm68_vm1, %v2541_v53, %v1913_v33  ;;  %v1985_v58 = vsel %vm68_vm1, %v1984_v21, %v1983_v49  ;;  %v3562_v53 = vrot.slane %v4396_v51, 1 }
 0x2c7   :  { %1002 = vrot.lane.b32.xlu2 %v3183_v44, %s2708_s12  ;;  %v3529_v22 = vpop.trf.xlu2  ;;  %v1906_v44 = vsel %vm68_vm1, %v1737_v9, %v1905_v1  ;;  %v1955_v4 = vsel %vm65_vm0, %v2558_v37, %v1665_v61  ;;  %v2571_v9 = vrot.slane %v3378_v27, 11  ;;  %v1969_v37 = vsel %vm65_vm0, %v2564_v24, %v1697_v25 }
 0x2c8   :  { %v1945_v1 = vsel %vm71_vm2, %v3378_v27, %v1943_v18  ;;  %v1948_v61 = vrot.slane %v4428_v23, 3  ;;  %v1907_v11 = vsel %vm71_vm2, %v1709_v16, %v1906_v44  ;;  %v4429_v24 = vrot.slane %v3529_v22, 2  ;;  %v3581_v44 = vpop.trf.xlu1 }
 0x2c9   :  { %v1917_v25 = vsel %vm71_vm2, %v2542_v7, %v1915_v46  ;;  %v1987_v49 = vsel %vm71_vm2, %v2571_v9, %v1985_v58  ;;  %v1761_v51 = vrot.slane %v3350_v57, 7  ;;  %v1957_v9 = vsel %vm68_vm1, %v2559_v28, %v1955_v4 }
 0x2ca   :  { %v1936_v18 = vrot.slane %v4429_v24, 2  ;;  %v2563_v33 = vrot.slane %v3518_v56, 5  ;;  %v1570_v46 = vrot.slane %v3359_v42, 1  ;;  %v2568_v4 = vrot.slane %v3529_v22, 7 }
 0x2cb   :  { %v3527_v5 = vpop.trf.xlu0  ;;  %v1997_v57 = vsel %vm65_vm0, %v3485_v43, %v1761_v51  ;;  %v2569_v28 = vrot.slane %v3518_v56, 6 }
 0x2cc   :  { %4427 = vst [vmem:[#allocation9_spill] sm:$0xff] %v3527_v5  ;;  %v1972_v5 = vrot.slane %v1709_v16, 5  ;;  %v1598_v16 = vrot.slane %v3581_v44, 1 }
 0x2cd   :  { %1119 = vrot.lane.b32.xlu0 %v1020_v47, %s2710_s13  ;;  %v2544_v47 = vrot.slane %v3367_v17, 4 }
 0x2cf   :  { %1121 = vrot.lane.b32.xlu2 %v3450_v60, %s2710_s13  ;;  %v2556_v60 = vrot.slane %v3529_v22, 5 }
 0x2d3   :  { %v3569_v21 = vpop.trf.xlu0 }
 0x2d4   :  { %v2549_v48 = vrot.slane %v3569_v21, 6  ;;  %v2555_v24 = vrot.slane %v3569_v21, 7  ;;  %v1681_v7 = vrot.slane %v3569_v21, 4  ;;  %v2543_v58 = vrot.slane %v3569_v21, 5 }
 0x2d5   :  { %1125 = vrot.lane.b32.xlu0 %v3454_v30, %s2710_s13 }
 0x2d6   :  { %v1933_v23 = vsel %vm642_vm3, %v2549_v48, %v1931_v63  ;;  %v1947_v36 = vsel %vm642_vm3, %v2555_v24, %v1945_v1  ;;  %v1908_v38 = vsel %vm642_vm3, %v1681_v7, %v1907_v11  ;;  %v1959_v48 = vsel %vm71_vm2, %v2560_v20, %v1957_v9 }
 0x2d7   :  { %1127 = vrot.lane.b32.xlu2 %v3461_v8, %s2710_s13  ;;  %v1935_v30 = vsel %vm644_vm4, %v2550_v54, %v1933_v23  ;;  %v4430_v63 = vrot.slane %v3402_v35, 11  ;;  %v4431_v8 = vrot.slane %v3518_v56, 3  ;;  %v1949_v11 = vsel %vm644_vm4, %v1948_v61, %v1947_v36 }
 0x2d8   :  { %v1937_v43 = vsel %vm646_vm5, %v1936_v18, %v1935_v30  ;;  %v1919_v1 = vsel %vm642_vm3, %v2543_v58, %v1917_v25  ;;  %v2572_v23 = vrot.slane %v3569_v21, 10  ;;  %v4432_v20 = vrot.slane %v3367_v17, 3 }
 0x2d9   :  { %v1971_v51 = vsel %vm68_vm1, %v4430_v63, %v1969_v37  ;;  %v1939_v54 = vsel %vm648_vm6, %v4431_v8, %v1937_v43  ;;  %v2042_v37 = vsel %vm65_vm0, %v3347_v52, %v1570_v46  ;;  %v2584_v24 = vrot.slane %v3397_v34, 6 }
 0x2da   :  { %2014 = vrot.lane.b32.xlu1 %v1939_v54, %s2709_s0  ;;  %v1909_v18 = vsel %vm644_vm4, %v4432_v20, %v1908_v38  ;;  %v2586_v9 = vrot.slane %v3385_v14, 4  ;;  %v2566_v36 = vrot.slane %v3569_v21, 9  ;;  %v4433_v61 = vrot.slane %v3428_v40, 7  ;;  %v3625_v38 = vpop.trf.xlu2 }
 0x2db   :  { %v3617_v30 = vpop.trf.xlu0  ;;  %v2577_v58 = vrot.slane %v3378_v27, 12  ;;  %v2578_v43 = vrot.slane %v3569_v21, 11  ;;  %v1951_v46 = vsel %vm646_vm5, %v2556_v60, %v1949_v11  ;;  %v1921_v63 = vsel %vm644_vm4, %v2544_v47, %v1919_v1 }
 0x2dc   :  { %v2044_v25 = vsel %vm68_vm1, %v4433_v61, %v2042_v37  ;;  %v1960_v8 = vrot.slane %v1681_v7, 4  ;;  %v4434_v54 = vrot.slane %v3402_v35, 13  ;;  %v4435_v37 = vrot.slane %v3529_v22, 2 }
 0x2dd   :  { %1131 = vrot.lane.b32.xlu0 %v3471_v15, %s2710_s13  ;;  %v1989_v21 = vsel %vm642_vm3, %v2572_v23, %v1987_v49  ;;  %v2585_v61 = vrot.slane %v3617_v30, 5  ;;  %v2587_v60 = vrot.slane %v3625_v38, 3  ;;  %v1973_v47 = vsel %vm71_vm2, %v1972_v5, %v1971_v51  ;;  %v3655_v23 = vpop.trf.xlu1 }
 0x2de   :  { %v1999_v20 = vsel %vm68_vm1, %v4434_v54, %v1997_v57  ;;  %v1910_v27 = vsel %vm646_vm5, %v4435_v37, %v1909_v18  ;;  %v2046_v7 = vsel %vm71_vm2, %v2584_v24, %v2044_v25  ;;  %v2053_v35 = vrot.slane %v1598_v16, 1 }
 0x2df   :  { %v2579_v57 = vrot.slane %v3367_v17, 10  ;;  %1133 = vrot.lane.b32.xlu2 %v3476_v12, %s2710_s13  ;;  %v4436_v15 = vrot.slane %v3518_v56, 4  ;;  %v4437_v11 = vrot.slane %v3529_v22, 3  ;;  %v1975_v5 = vsel %vm642_vm3, %v2566_v36, %v1973_v47 }
 0x2e0   :  { %v2001_v51 = vsel %vm71_vm2, %v2577_v58, %v1999_v20  ;;  %v4438_v18 = vrot.slane %v3518_v56, 1  ;;  %v4439_v12 = vrot.slane %v3367_v17, 9  ;;  %v1682_v36 = vrot.slane %v3617_v30, 4 }
 0x2e1   :  { %v1953_v49 = vsel %vm648_vm6, %v4436_v15, %v1951_v46  ;;  %v1923_v1 = vsel %vm646_vm5, %v4437_v11, %v1921_v63  ;;  %v1961_v46 = vsel %vm642_vm3, %v1960_v8, %v1959_v48  ;;  %v2003_v54 = vsel %vm642_vm3, %v2578_v43, %v2001_v51 }
 0x2e2   :  { %v1911_v24 = vsel %vm648_vm6, %v4438_v18, %v1910_v27  ;;  %v1991_v25 = vsel %vm644_vm4, %v4439_v12, %v1989_v21  ;;  %v2048_v63 = vsel %vm642_vm3, %v2585_v61, %v2046_v7  ;;  %v4440_v58 = vrot.slane %v3347_v52, 7  ;;  %2016 = vrot.lane.b32.xlu1 %v1953_v49, %s2709_s0 }
 0x2e3   :  { %v1666_v37 = vrot.slane %v3359_v42, 4  ;;  %v1977_v27 = vsel %vm644_vm4, %v3367_v17, %v1975_v5  ;;  %v2580_v48 = vrot.slane %v3529_v22, 9  ;;  %v1710_v43 = vrot.slane %v3397_v34, 5 }
 0x2e4   :  { %v2034_v20 = vsel %vm65_vm0, %v4440_v58, %v3359_v42  ;;  %v4441_v8 = vrot.slane %v3428_v40, 6  ;;  %v1925_v61 = vsel %vm648_vm6, %v3562_v53, %v1923_v1  ;;  %v1993_v47 = vsel %vm646_vm5, %v3529_v22, %v1991_v25 }
 0x2e5   :  { %v4442_v7 = vrot.slane %v3367_v17, 7  ;;  %v2005_v49 = vsel %vm644_vm4, %v2579_v57, %v2003_v54  ;;  %v2050_v11 = vsel %vm644_vm4, %v2586_v9, %v2048_v63  ;;  %v4443_v51 = vrot.slane %v3347_v52, 11  ;;  %2010 = vrot.lane.b32.xlu0 %v1911_v24, %s2709_s0 }
 0x2e6   :  { %v2035_v21 = vsel %vm68_vm1, %v4441_v8, %v2034_v20  ;;  %v2602_v12 = vrot.slane %v3397_v34, 9  ;;  %v1979_v17 = vsel %vm646_vm5, %v2568_v4, %v1977_v27  ;;  %v4444_v57 = vrot.slane %v3428_v40, 10 }
 0x2e7   :  { %v1963_v15 = vsel %vm644_vm4, %v4442_v7, %v1961_v46  ;;  %v2036_v5 = vsel %vm71_vm2, %v1710_v43, %v2035_v21  ;;  %v2084_v18 = vsel %vm65_vm0, %v4443_v51, %v1666_v37  ;;  %v2089_v1 = vrot.slane %v1682_v36, 4  ;;  %2012 = vrot.lane.b32.xlu2 %v1925_v61, %s2709_s0 }
 0x2e8   :  { %v2037_v53 = vsel %vm642_vm3, %v1682_v36, %v2036_v5  ;;  %v2086_v9 = vsel %vm68_vm1, %v4444_v57, %v2084_v18  ;;  %v4445_v25 = vrot.slane %v3529_v22, 6  ;;  %v2007_v54 = vsel %vm646_vm5, %v2580_v48, %v2005_v49 }
 0x2e9   :  { %v1654_v63 = vrot.slane %v3385_v14, 3  ;;  %v1602_v24 = vrot.slane %v3359_v42, 2  ;;  %v2607_v58 = vrot.slane %v3428_v40, 11  ;;  %v2618_v4 = vrot.slane %v3428_v40, 13 }
 0x2ea   :  { %v1965_v46 = vsel %vm646_vm5, %v4445_v25, %v1963_v15  ;;  %v4446_v20 = vrot.slane %v3518_v56, 7  ;;  %v2052_v22 = vsel %vm646_vm5, %v2587_v60, %v2050_v11  ;;  %v1981_v37 = vsel %vm648_vm6, %v2569_v28, %v1979_v17  ;;  %v3731_v28 = vpop.permute.xlu1 %863 }
 0x2eb   :  { %v2038_v27 = vsel %vm644_vm4, %v1654_v63, %v2037_v53  ;;  %v2088_v48 = vsel %vm71_vm2, %v2602_v12, %v2086_v9  ;;  %v1634_v8 = vrot.slane %v3359_v42, 3  ;;  %v1967_v21 = vsel %vm648_vm6, %v2563_v33, %v1965_v46 }
 0x2ec   :  { %v1995_v36 = vsel %vm648_vm6, %v4446_v20, %v1993_v47  ;;  %v2009_v61 = vsel %vm648_vm6, %v3518_v56, %v2007_v54  ;;  %v1626_v60 = vrot.slane %v3625_v38, 2  ;;  %v2090_v47 = vsel %vm642_vm3, %v2089_v1, %v2088_v48 }
 0x2ed   :  { %2022 = vrot.lane.b32.xlu1 %v1995_v36, %s2709_s0  ;;  %v2054_v7 = vsel %vm648_vm6, %v2053_v35, %v2052_v22  ;;  %v2603_v15 = vrot.slane %v3385_v14, 7  ;;  %v4447_v49 = vrot.slane %v3347_v52, 9  ;;  %v2590_v11 = vrot.slane %v3397_v34, 7  ;;  %2018 = vrot.lane.b32.xlu0 %v1967_v21, %s2709_s0 }
 0x2ee   :  { %v2039_v56 = vsel %vm646_vm5, %v1626_v60, %v2038_v27  ;;  %v2604_v5 = vrot.slane %v3625_v38, 6  ;;  %v2591_v18 = vrot.slane %v3617_v30, 6  ;;  %v2605_v35 = vrot.slane %v3581_v44, 5 }
 0x2ef   :  { %v2056_v33 = vsel %vm65_vm0, %v4447_v49, %v1602_v24  ;;  %v2092_v12 = vsel %vm644_vm4, %v2603_v15, %v2090_v47  ;;  %v4448_v17 = vrot.slane %v3347_v52, 10  ;;  %v1762_v57 = vrot.slane %v3359_v42, 7  ;;  %2020 = vrot.lane.b32.xlu2 %v1981_v37, %s2709_s0 }
 0x2f0   :  { %v2058_v51 = vsel %vm68_vm1, %v3428_v40, %v2056_v33  ;;  %v2592_v9 = vrot.slane %v3385_v14, 5  ;;  %v2065_v1 = vrot.slane %v1626_v60, 2  ;;  %v4449_v25 = vrot.slane %v3428_v40, 9 }
 0x2f1   :  { %v2070_v53 = vsel %vm65_vm0, %v4448_v17, %v1634_v8  ;;  %v1698_v54 = vrot.slane %v3359_v42, 5  ;;  %v2040_v24 = vsel %vm648_vm6, %v1598_v16, %v2039_v56  ;;  %v2060_v20 = vsel %vm71_vm2, %v2590_v11, %v2058_v51 }
 0x2f2   :  { %v2072_v46 = vsel %vm68_vm1, %v4449_v25, %v2070_v53  ;;  %v2101_v36 = vrot.slane %v1710_v43, 5  ;;  %v2608_v22 = vrot.slane %v3617_v30, 9  ;;  %v2094_v27 = vsel %vm646_vm5, %v2604_v5, %v2092_v12  ;;  %v868_v5 = vpop.permute.xlu1 %867 }
 0x2f3   :  { %v2062_v48 = vsel %vm642_vm3, %v2591_v18, %v2060_v20  ;;  %v2597_v8 = vrot.slane %v3617_v30, 7  ;;  %v4450_v21 = vrot.slane %v3347_v52, 12  ;;  %v2074_v16 = vsel %vm71_vm2, %v3397_v34, %v2072_v46  ;;  %v3804_v46 = vpop.trf.xlu0 }
 0x2f4   :  { %v2126_v43 = vsel %vm65_vm0, %v3494_v62, %v1762_v57  ;;  %v2619_v47 = vrot.slane %v3397_v34, 12  ;;  %v2620_v15 = vrot.slane %v3617_v30, 11  ;;  %v1730_v33 = vrot.slane %v3359_v42, 6 }
 0x2f5   :  { %v2098_v60 = vsel %vm65_vm0, %v4450_v21, %v1698_v54  ;;  %v4451_v11 = vrot.slane %v3428_v40, 6  ;;  %2141 = vrot.lane.b32.xlu1 %v2054_v7, %s2708_s12  ;;  %v2128_v51 = vsel %vm68_vm1, %v2618_v4, %v2126_v43  ;;  %v2613_v18 = vrot.slane %v3397_v34, 11  ;;  %2024 = vrot.lane.b32.xlu0 %v2009_v61, %s2709_s0 }
 0x2f6   :  { %v2100_v37 = vsel %vm68_vm1, %v2607_v58, %v2098_v60  ;;  %v2614_v58 = vrot.slane %v3617_v30, 10  ;;  %v3786_v12 = vsel %vm1143_vm7, %v3465_v6, %v868_v5  ;;  %v2076_v42 = vsel %vm642_vm3, %v2597_v8, %v2074_v16 }
 0x2f7   :  { %v2102_v49 = vsel %vm71_vm2, %v2101_v36, %v2100_v37  ;;  %v2113_v56 = vrot.slane %v4451_v11, 6  ;;  %v4452_v7 = vrot.slane %v3347_v52, 13  ;;  %v2064_v4 = vsel %vm644_vm4, %v2592_v9, %v2062_v48  ;;  %2139 = vrot.lane.b32.xlu2 %v2040_v24, %s2708_s12 }
 0x2f8   :  { %v2104_v62 = vsel %vm642_vm3, %v2608_v22, %v2102_v49  ;;  %v2077_v34 = vrot.slane %v1654_v63, 3  ;;  %v1603_v53 = vrot.slane %v3370_v19, 2  ;;  %v2598_v6 = vrot.slane %v3625_v38, 5 }
 0x2f9   :  { %v2106_v40 = vsel %vm644_vm4, %v3385_v14, %v2104_v62  ;;  %v2112_v17 = vsel %vm65_vm0, %v4452_v7, %v1730_v33  ;;  %v2130_v57 = vsel %vm71_vm2, %v2619_v47, %v2128_v51  ;;  %v2615_v52 = vrot.slane %v3385_v14, 9  ;;  %v3821_v47 = vpop.trf.xlu2 }
 0x2fa   :  { %v2114_v30 = vsel %vm68_vm1, %v2113_v56, %v2112_v17  ;;  %v2593_v9 = vrot.slane %v3581_v44, 3  ;;  %v2078_v63 = vsel %vm644_vm4, %v2077_v34, %v2076_v42  ;;  %v2132_v54 = vsel %vm642_vm3, %v2620_v15, %v2130_v57  ;;  %v3840_v62 = vpop.permute.xlu1 %869 }
 0x2fb   :  { %v2116_v25 = vsel %vm71_vm2, %v2613_v18, %v2114_v30  ;;  %v2096_v61 = vsel %vm648_vm6, %v2605_v35, %v2094_v27  ;;  %v2066_v36 = vsel %vm646_vm5, %v2065_v1, %v2064_v4  ;;  %v2621_v22 = vrot.slane %v3385_v14, 10 }
 0x2fc   :  { %v2118_v20 = vsel %vm642_vm3, %v2614_v58, %v2116_v25  ;;  %v2599_v8 = vrot.slane %v3581_v44, 4  ;;  %v2622_v21 = vrot.slane %v3625_v38, 9  ;;  %v4453_v60 = vrot.slane %v3354_v45, 9 }
 0x2fd   :  { %v2120_v48 = vsel %vm644_vm4, %v2615_v52, %v2118_v20  ;;  %v2632_v43 = vrot.slane %v3417_v55, 7  ;;  %v2080_v35 = vsel %vm646_vm5, %v2598_v6, %v2078_v63  ;;  %v2134_v1 = vsel %vm644_vm4, %v2621_v22, %v2132_v54  ;;  %2147 = vrot.lane.b32.xlu1 %v2096_v61, %s2708_s12 }
 0x2fe   :  { %v2185_v16 = vsel %vm65_vm0, %v4453_v60, %v1603_v53  ;;  %v2633_v24 = vrot.slane %v3804_v46, 6  ;;  %v4454_v27 = vrot.slane %v3354_v45, 7  ;;  %v1739_v15 = vrot.slane %v3480_v31, 6 }
 0x2ff   :  { %v2187_v14 = vsel %vm68_vm1, %v3480_v31, %v2185_v16  ;;  %v2625_v49 = vrot.slane %v3480_v31, 7  ;;  %v2637_v33 = vrot.slane %v3480_v31, 9  ;;  %v2643_v11 = vrot.slane %v3480_v31, 10 }
 0x300   :  { %v3830_v37 = vrot.slane %v4454_v27, 7  ;;  %v2649_v56 = vrot.slane %v3480_v31, 11  ;;  %v2068_v5 = vsel %vm648_vm6, %v2593_v9, %v2066_v36  ;;  %v1571_v51 = vrot.slane %v3370_v19, 1 }
 0x301   :  { %v2082_v18 = vsel %vm648_vm6, %v2599_v8, %v2080_v35  ;;  %v2136_v58 = vsel %vm646_vm5, %v2622_v21, %v2134_v1  ;;  %v2610_v42 = vrot.slane %v3625_v38, 7  ;;  %v2189_v7 = vsel %vm71_vm2, %v2632_v43, %v2187_v14  ;;  %2143 = vrot.lane.b32.xlu0 %v2068_v5, %s2708_s12  ;;  %v3871_v21 = vpop.permute.xlu2 %865 }
 0x302   :  { %v2611_v17 = vrot.slane %v3581_v44, 6  ;;  %v1627_v4 = vrot.slane %v3821_v47, 2  ;;  %v2191_v34 = vsel %vm642_vm3, %v2633_v24, %v2189_v7  ;;  %v4455_v30 = vmov %v4454_v27  ;;  %2145 = vrot.lane.b32.xlu2 %v2082_v18, %s2708_s12 }
 0x303   :  { %v2163_v53 = vsel %vm65_vm0, %v4455_v30, %v3370_v19  ;;  %v1683_v6 = vrot.slane %v3804_v46, 4  ;;  %v1711_v57 = vrot.slane %v3417_v55, 5  ;;  %v1699_v52 = vrot.slane %v3370_v19, 5  ;;  %v3896_v30 = vpop.permute.xlu1 %873 }
 0x304   :  { %v2164_v25 = vsel %vm68_vm1, %v1739_v15, %v2163_v53  ;;  %v2138_v9 = vsel %vm648_vm6, %v3581_v44, %v2136_v58  ;;  %v2634_v63 = vrot.slane %v3408_v50, 5  ;;  %v2171_v54 = vsel %vm65_vm0, %v3354_v45, %v1571_v51 }
 0x305   :  { %v2626_v20 = vrot.slane %v3417_v55, 6  ;;  %v2108_v61 = vsel %vm646_vm5, %v2610_v42, %v2106_v40  ;;  %v2617_v36 = vrot.slane %v3581_v44, 7  ;;  %v2173_v22 = vsel %vm68_vm1, %v2625_v49, %v2171_v54  ;;  %2153 = vrot.lane.b32.xlu1 %v2138_v9, %s2708_s12 }
 0x306   :  { %v2627_v8 = vrot.slane %v3804_v46, 5  ;;  %v2122_v60 = vsel %vm646_vm5, %v3625_v38, %v2120_v48  ;;  %v2193_v16 = vsel %vm644_vm4, %v2634_v63, %v2191_v34  ;;  %v2194_v43 = vrot.slane %v1627_v4, 2 }
 0x307   :  { %v2165_v35 = vsel %vm71_vm2, %v1711_v57, %v2164_v25  ;;  %v4456_v44 = vrot.slane %v3354_v45, 12  ;;  %v2230_v14 = vrot.slane %v1711_v57, 5  ;;  %v1635_v24 = vrot.slane %v3370_v19, 3 }
 0x308   :  { %v2166_v40 = vsel %vm642_vm3, %v1683_v6, %v2165_v35  ;;  %v1655_v27 = vrot.slane %v3408_v50, 3  ;;  %v2175_v38 = vsel %vm71_vm2, %v2626_v20, %v2173_v22  ;;  %v2650_v49 = vrot.slane %v3804_v46, 9 }
 0x309   :  { %v2227_v1 = vsel %vm65_vm0, %v4456_v44, %v1699_v52  ;;  %v2110_v5 = vsel %vm648_vm6, %v2611_v17, %v2108_v61  ;;  %v2635_v51 = vrot.slane %v3655_v23, 3  ;;  %v1599_v18 = vrot.slane %v3655_v23, 1 }
 0x30a   :  { %v2229_v48 = vsel %vm68_vm1, %v2649_v56, %v2227_v1  ;;  %v2177_v58 = vsel %vm642_vm3, %v2627_v8, %v2175_v38  ;;  %2149 = vrot.lane.b32.xlu0 %v2110_v5, %s2708_s12  ;;  %v2195_v42 = vsel %vm646_vm5, %v2194_v43, %v2193_v16  ;;  %v2167_v7 = vsel %vm644_vm4, %v1655_v27, %v2166_v40  ;;  %v3915_v16 = vpop.permute.xlu2 %871 }
 0x30b   :  { %v2628_v34 = vrot.slane %v3408_v50, 4  ;;  %v1667_v56 = vrot.slane %v3370_v19, 4  ;;  %v2124_v17 = vsel %vm648_vm6, %v2617_v36, %v2122_v60  ;;  %v2629_v53 = vrot.slane %v3821_v47, 3 }
 0x30c   :  { %v2231_v57 = vsel %vm71_vm2, %v2230_v14, %v2229_v48  ;;  %v4457_v25 = vrot.slane %v3354_v45, 10  ;;  %2151 = vrot.lane.b32.xlu2 %v2124_v17, %s2708_s12  ;;  %v2639_v20 = vrot.slane %v3804_v46, 7  ;;  %v2197_v61 = vsel %vm648_vm6, %v2635_v51, %v2195_v42 }
 0x30d   :  { %v2179_v9 = vsel %vm644_vm4, %v2628_v34, %v2177_v58  ;;  %v2233_v63 = vsel %vm642_vm3, %v2650_v49, %v2231_v57  ;;  %v2168_v36 = vsel %vm646_vm5, %v1627_v4, %v2167_v7  ;;  %v4458_v22 = vrot.slane %v3354_v45, 11  ;;  %2272 = vrot.lane.b32.xlu1 %v2197_v61, %s2710_s13  ;;  %v3951_v57 = vpop.permute.xlu1 %992 }
 0x30e   :  { %v2199_v52 = vsel %vm65_vm0, %v4457_v25, %v1635_v24  ;;  %v2644_v60 = vrot.slane %v3417_v55, 9  ;;  %v2182_v43 = vrot.slane %v1599_v18, 1  ;;  %v2652_v35 = vrot.slane %v3821_v47, 7 }
 0x30f   :  { %v2201_v54 = vsel %vm68_vm1, %v2637_v33, %v2199_v52  ;;  %v2213_v8 = vsel %vm65_vm0, %v4458_v22, %v1667_v56  ;;  %v2218_v40 = vrot.slane %v1683_v6, 4  ;;  %v2181_v4 = vsel %vm646_vm5, %v2629_v53, %v2179_v9 }
 0x310   :  { %v2215_v33 = vsel %vm68_vm1, %v2643_v11, %v2213_v8  ;;  %v2235_v44 = vsel %vm644_vm4, %v3408_v50, %v2233_v63  ;;  %v2203_v1 = vsel %vm71_vm2, %v3417_v55, %v2201_v54  ;;  %v1731_v14 = vrot.slane %v3370_v19, 6 }
 0x311   :  { %v2660_v24 = vrot.slane %v3480_v31, 13  ;;  %v2169_v38 = vsel %vm648_vm6, %v1599_v18, %v2168_v36  ;;  %v2205_v48 = vsel %vm642_vm3, %v2639_v20, %v2203_v1  ;;  %v2242_v11 = vrot.slane %v1739_v15, 6 }
 0x312   :  { %v2653_v6 = vrot.slane %v3655_v23, 6  ;;  %v2206_v49 = vrot.slane %v1655_v27, 3  ;;  %v2217_v5 = vsel %vm71_vm2, %v2644_v60, %v2215_v33  ;;  %v1763_v51 = vrot.slane %v3370_v19, 7  ;;  %2268 = vrot.lane.b32.xlu0 %v2169_v38, %s2710_s13  ;;  %v3958_v63 = vpop.permute.xlu2 %990 }
 0x313   :  { %v2183_v58 = vsel %vm648_vm6, %v2182_v43, %v2181_v4  ;;  %v2237_v42 = vsel %vm646_vm5, %v2652_v35, %v2235_v44  ;;  %v2640_v18 = vrot.slane %v3821_v47, 5  ;;  %v2219_v7 = vsel %vm642_vm3, %v2218_v40, %v2217_v5 }
 0x314   :  { %v2207_v31 = vsel %vm644_vm4, %v2206_v49, %v2205_v48  ;;  %v2645_v15 = vrot.slane %v3408_v50, 7  ;;  %v4459_v27 = vrot.slane %v3354_v45, 13  ;;  %v2655_v19 = vrot.slane %v3417_v55, 11  ;;  %2270 = vrot.lane.b32.xlu2 %v2183_v58, %s2710_s13 }
 0x315   :  { %v2646_v56 = vrot.slane %v3821_v47, 6  ;;  %v2656_v53 = vrot.slane %v3804_v46, 10  ;;  %v2641_v25 = vrot.slane %v3655_v23, 4  ;;  %v2255_v45 = vsel %vm65_vm0, %v3830_v37, %v1763_v51 }
 0x316   :  { %v2241_v34 = vsel %vm65_vm0, %v4459_v27, %v1731_v14  ;;  %v2221_v52 = vsel %vm644_vm4, %v2645_v15, %v2219_v7  ;;  %v2661_v9 = vrot.slane %v3417_v55, 12  ;;  %v2239_v54 = vsel %vm648_vm6, %v2653_v6, %v2237_v42  ;;  %v3994_v42 = vpop.permute.xlu1 %998 }
 0x317   :  { %v2243_v17 = vsel %vm68_vm1, %v2242_v11, %v2241_v34  ;;  %v2209_v20 = vsel %vm646_vm5, %v2640_v18, %v2207_v31  ;;  %v2257_v61 = vsel %vm68_vm1, %v2660_v24, %v2255_v45  ;;  %v2662_v36 = vrot.slane %v3804_v46, 11  ;;  %2278 = vrot.lane.b32.xlu1 %v2239_v54, %s2710_s13 }
 0x318   :  { %v2647_v22 = vrot.slane %v3655_v23, 5  ;;  %v2245_v8 = vsel %vm71_vm2, %v2655_v19, %v2243_v17  ;;  %v415_v37 = vrot.slane %v2753_v2, 1  ;;  %v2223_v55 = vsel %vm646_vm5, %v2646_v56, %v2221_v52 }
 0x319   :  { %v2247_v60 = vsel %vm642_vm3, %v2656_v53, %v2245_v8  ;;  %v2331_v43 = vrot.slane %v2769_v10, 7  ;;  %v2211_v35 = vsel %vm648_vm6, %v2641_v25, %v2209_v20  ;;  %v2657_v33 = vrot.slane %v3408_v50, 9 }
 0x31a   :  { %v2259_v46 = vsel %vm71_vm2, %v2661_v9, %v2257_v61  ;;  %v651_v40 = vsel %vm65_vm0, %v2775_v13, %v415_v37  ;;  %2274 = vrot.lane.b32.xlu0 %v2211_v35, %s2710_s13  ;;  %v2225_v44 = vsel %vm648_vm6, %v2647_v22, %v2223_v55  ;;  %v2663_v14 = vrot.slane %v3408_v50, 10  ;;  %v3988_v5 = vpop.permute.xlu2 %996 }
 0x31b   :  { %v2261_v4 = vsel %vm642_vm3, %v2662_v36, %v2259_v46  ;;  %v2249_v1 = vsel %vm644_vm4, %v2657_v33, %v2247_v60  ;;  %v2332_v24 = vrot.slane %v2749_v0, 6  ;;  %v2664_v38 = vrot.slane %v3821_v47, 9 }
 0x31c   :  { %2276 = vrot.lane.b32.xlu2 %v2225_v44, %s2710_s13  ;;  %v653_v48 = vsel %vm68_vm1, %v2331_v43, %v651_v40  ;;  %v2659_v11 = vrot.slane %v3655_v23, 7  ;;  %v2263_v6 = vsel %vm644_vm4, %v2663_v14, %v2261_v4  ;;  %v2348_v49 = vrot.slane %v2775_v13, 11 }
 0x31d   :  { %v2251_v51 = vsel %vm646_vm5, %v3821_v47, %v2249_v1  ;;  %v2336_v50 = vrot.slane %v2775_v13, 9  ;;  %v2333_v58 = vrot.slane %v2755_v3, 5  ;;  %v511_v18 = vrot.slane %v2753_v2, 4 }
 0x31e   :  { %v655_v7 = vsel %vm71_vm2, %v2332_v24, %v653_v48  ;;  %v2265_v31 = vsel %vm646_vm5, %v2664_v38, %v2263_v6  ;;  %v447_v15 = vrot.slane %v2753_v2, 2  ;;  %v527_v27 = vrot.slane %v2755_v3, 4  ;;  %v4039_v48 = vpop.permute.xlu1 %1004 }
 0x31f   :  { %v2349_v34 = vrot.slane %v2769_v10, 10  ;;  %v2253_v47 = vsel %vm648_vm6, %v2659_v11, %v2251_v51  ;;  %v611_v19 = vrot.slane %v2775_v13, 7  ;;  %v443_v56 = vrot.slane %v2950_v26, 1  ;;  %v4014_v20 = vpop.permute.xlu0 %861 }
 0x320   :  { %v2334_v17 = vrot.slane %v2796_v29, 4  ;;  %v693_v53 = vsel %vm65_vm0, %v2348_v49, %v511_v18  ;;  %v657_v25 = vsel %vm642_vm3, %v2333_v58, %v655_v7  ;;  %v2335_v52 = vrot.slane %v2960_v41, 3 }
 0x321   :  { %v665_v45 = vsel %vm65_vm0, %v2336_v50, %v447_v15  ;;  %v2267_v9 = vsel %vm648_vm6, %v3655_v23, %v2265_v31  ;;  %v2350_v54 = vrot.slane %v2749_v0, 9  ;;  %v2338_v61 = vrot.slane %v2749_v0, 7 }
 0x322   :  { %2280 = vrot.lane.b32.xlu0 %v2253_v47, %s2710_s13  ;;  %v695_v36 = vsel %vm68_vm1, %v2349_v34, %v693_v53  ;;  %v734_v22 = vrot.slane %v611_v19, 7  ;;  %v659_v8 = vsel %vm644_vm4, %v2334_v17, %v657_v25  ;;  %v662_v37 = vrot.slane %v443_v56, 1  ;;  %v4024_v23 = vpop.permute.xlu2 %1002 }
 0x323   :  { %v667_v55 = vsel %vm68_vm1, %v2769_v10, %v665_v45  ;;  %v555_v60 = vrot.slane %v2749_v0, 5  ;;  %v2354_v43 = vrot.slane %v2775_v13, 12  ;;  %v661_v35 = vsel %vm646_vm5, %v2335_v52, %v659_v8 }
 0x324   :  { %2282 = vrot.lane.b32.xlu2 %v2267_v9, %s2710_s13  ;;  %v698_v33 = vrot.slane %v527_v27, 4  ;;  %v607_v46 = vrot.slane %v2753_v2, 7  ;;  %v697_v40 = vsel %vm71_vm2, %v2350_v54, %v695_v36  ;;  %v471_v4 = vrot.slane %v2960_v41, 2 }
 0x325   :  { %v2339_v44 = vrot.slane %v2755_v3, 6  ;;  %v2367_v1 = vrot.slane %v2749_v0, 12  ;;  %v543_v14 = vrot.slane %v2753_v2, 5  ;;  %v2366_v24 = vrot.slane %v2769_v10, 13 }
 0x326   :  { %v669_v38 = vsel %vm71_vm2, %v2338_v61, %v667_v55  ;;  %v2355_v11 = vrot.slane %v2769_v10, 11  ;;  %v663_v6 = vsel %vm648_vm6, %v662_v37, %v661_v35  ;;  %v2351_v49 = vrot.slane %v2796_v29, 7 }
 0x327   :  { %v735_v51 = vsel %vm65_vm0, %v734_v22, %v607_v46  ;;  %v699_v50 = vsel %vm642_vm3, %v698_v33, %v697_v40  ;;  %v2340_v58 = vrot.slane %v2796_v29, 5  ;;  %v707_v18 = vsel %vm65_vm0, %v2354_v43, %v543_v14  ;;  %v876_v34 = vpop.permute.xlu0 %875 }
 0x328   :  { %v2352_v7 = vrot.slane %v2960_v41, 6  ;;  %v671_v31 = vsel %vm642_vm3, %v2339_v44, %v669_v38  ;;  %v674_v15 = vrot.slane %v471_v4, 2  ;;  %v1145_v47 = vsel %vm1143_vm7, %v663_v6, %v3731_v28 }
 0x329   :  { %v710_v17 = vrot.slane %v555_v60, 5  ;;  %v737_v53 = vsel %vm68_vm1, %v2366_v24, %v735_v51  ;;  %v701_v25 = vsel %vm644_vm4, %v2351_v49, %v699_v50  ;;  %v2353_v52 = vrot.slane %v2950_v26, 5 }
 0x32a   :  { %v709_v45 = vsel %vm68_vm1, %v2355_v11, %v707_v18  ;;  %v1154_v9 = vsel %vm1152_vm8, %v1145_v47, %v3951_v57  ;;  %v1122_v54 = vpop.permute.xlu2 %1121  ;;  %v673_v61 = vsel %vm644_vm4, %v2340_v58, %v671_v31  ;;  %v2341_v36 = vrot.slane %v2950_v26, 3 }
 0x32b   :  { %v2368_v28 = vrot.slane %v2755_v3, 11  ;;  %v1163_v22 = vsel %vm1161_vm9, %v1154_v9, %v1122_v54  ;;  %v675_v8 = vsel %vm646_vm5, %v674_v15, %v673_v61  ;;  %v2356_v37 = vrot.slane %v2755_v3, 9 }
 0x32c   :  { %v639_v55 = vsel %vm65_vm0, %v611_v19, %v2753_v2  ;;  %v739_v43 = vsel %vm71_vm2, %v2367_v1, %v737_v53  ;;  %1172 = vst.msk [vmem:[%s4388_s1 + $0x8] sm:$0xff] %vm1170_vm10, %v1163_v22  ;;  %v583_v57 = vrot.slane %v2769_v10, 6  ;;  %v703_v35 = vsel %vm646_vm5, %v2352_v7, %v701_v25  ;;  %v1124_v19 = vpop.permute.xlu1 %1123 }
 0x32d   :  { %v711_v33 = vsel %vm71_vm2, %v710_v17, %v709_v45  ;;  %v2369_v46 = vrot.slane %v2796_v29, 10  ;;  %v677_v40 = vsel %vm648_vm6, %v2341_v36, %v675_v8  ;;  %v741_v1 = vsel %vm642_vm3, %v2368_v28, %v739_v43 }
 0x32e   :  { %v640_v44 = vsel %vm68_vm1, %v583_v57, %v639_v55  ;;  %v2370_v14 = vrot.slane %v2960_v41, 9  ;;  %v705_v24 = vsel %vm648_vm6, %v2353_v52, %v703_v35  ;;  %v1146_v10 = vsel %vm1143_vm7, %v677_v40, %v3871_v21 }
 0x32f   :  { %v713_v38 = vsel %vm642_vm3, %v2356_v37, %v711_v33  ;;  %v2358_v11 = vrot.slane %v2960_v41, 7  ;;  %v995_v6 = vpop.permute.xlu0 %994  ;;  %v1148_v49 = vsel %vm1143_vm7, %v705_v24, %v3840_v62  ;;  %v641_v58 = vsel %vm71_vm2, %v555_v60, %v640_v44 }
 0x330   :  { %v1155_v51 = vsel %vm1152_vm8, %v1146_v10, %v995_v6  ;;  %v1157_v50 = vsel %vm1152_vm8, %v1148_v49, %v3994_v42  ;;  %v743_v18 = vsel %vm644_vm4, %v2369_v46, %v741_v1  ;;  %v715_v31 = vsel %vm644_vm4, %v2796_v29, %v713_v38 }
 0x331   :  { %v1164_v7 = vsel %vm1161_vm9, %v1155_v51, %v1124_v19  ;;  %v2359_v15 = vrot.slane %v2950_v26, 6  ;;  %v745_v47 = vsel %vm646_vm5, %v2370_v14, %v743_v18  ;;  %v717_v42 = vsel %vm646_vm5, %v2358_v11, %v715_v31  ;;  %v4461_v51 = vld [vmem:[#allocation5_spill] sm:$0xff] }
 0x332   :  { %v1128_v21 = vpop.permute.xlu2 %1127  ;;  %1173 = vst.msk [vmem:[%s4388_s1 + $0x10] sm:$0xff] %vm1170_vm10, %v1164_v7  ;;  %v643_v60 = vsel %vm642_vm3, %v527_v27, %v641_v58  ;;  %v747_v17 = vsel %vm648_vm6, %v2950_v26, %v745_v47  ;;  %v4460_v45 = vrot.slane %v2796_v29, 3  ;;  %v2360_v28 = vrot.slane %v2775_v13, 13  ;;  %v4462_v7 = vld [vmem:[#allocation9_spill] sm:$0xff] }
 0x333   :  { %v1166_v62 = vsel %vm1161_vm9, %v1157_v50, %v1128_v21  ;;  %v719_v53 = vsel %vm648_vm6, %v2359_v15, %v717_v42  ;;  %v1151_v25 = vsel %vm1143_vm7, %v747_v17, %v876_v34  ;;  %v722_v13 = vrot.slane %v583_v57, 6 }
 0x334   :  { %1175 = vst.msk [vmem:[%s4388_s1 + $0x20] sm:$0xff] %vm1170_vm10, %v1166_v62  ;;  %v1149_v52 = vsel %vm1143_vm7, %v719_v53, %v3915_v16  ;;  %v645_v9 = vsel %vm644_vm4, %v4460_v45, %v643_v60  ;;  %v1130_v27 = vpop.permute.xlu1 %1129  ;;  %v1160_v16 = vsel %vm1152_vm8, %v1151_v25, %v4039_v48  ;;  %v2361_v43 = vrot.slane %v2749_v0, 11  ;;  %v4463_v53 = vld [vmem:[#allocation7_spill] sm:$0xff] }
 0x335   :  { %v647_v61 = vsel %vm646_vm5, %v471_v4, %v645_v9  ;;  %v575_v4 = vrot.slane %v2753_v2, 6  ;;  %v2363_v0 = vrot.slane %v2796_v29, 9  ;;  %v2365_v14 = vrot.slane %v2950_v26, 7 }
 0x336   :  { %v649_v37 = vsel %vm648_vm6, %v443_v56, %v647_v61  ;;  %v1568_v6 = vrot.slane %v3341_v39, 1  ;;  %v2499_v49 = vrot.slane %v3382_v32, 7  ;;  %v2501_v21 = vrot.slane %v4462_v7, 5 }
 0x337   :  { %v1001_v54 = vpop.permute.xlu0 %1000  ;;  %v1144_v48 = vsel %vm1143_vm7, %v649_v37, %v4014_v20  ;;  %v721_v55 = vsel %vm65_vm0, %v2360_v28, %v575_v4  ;;  %v2362_v20 = vrot.slane %v2755_v3, 10  ;;  %v2516_v15 = vrot.slane %v4461_v51, 11 }
 0x338   :  { %v1158_v36 = vsel %vm1152_vm8, %v1149_v52, %v1001_v54  ;;  %v1153_v2 = vsel %vm1152_vm8, %v1144_v48, %v3958_v63  ;;  %v723_v33 = vsel %vm68_vm1, %v722_v13, %v721_v55  ;;  %v1156_v63 = vsel %vm1152_vm8, %v3786_v12, %v3988_v5  ;;  %v4464_v52 = vld [vmem:[#allocation6_spill] sm:$0xff]  ;;  %v4465_v54 = vld [vmem:[#allocation8_spill] sm:$0xff] }
 0x339   :  { %v1167_v22 = vsel %vm1161_vm9, %v1158_v36, %v1130_v27  ;;  %v725_v46 = vsel %vm71_vm2, %v2361_v43, %v723_v33  ;;  %v1800_v50 = vsel %vm65_vm0, %v4461_v51, %v1568_v6  ;;  %v1664_v47 = vrot.slane %v3341_v39, 4 }
 0x33a   :  { %v1134_v34 = vpop.permute.xlu2 %1133  ;;  %1176 = vst.msk [vmem:[%s4388_s1 + $0x28] sm:$0xff] %vm1170_vm10, %v1167_v22  ;;  %v727_v40 = vsel %vm642_vm3, %v2362_v20, %v725_v46  ;;  %v1802_v18 = vsel %vm68_vm1, %v2499_v49, %v1800_v50  ;;  %v2517_v42 = vrot.slane %v3382_v32, 10  ;;  %v1680_v17 = vrot.slane %v4462_v7, 4 }
 0x33b   :  { %v1169_v8 = vsel %vm1161_vm9, %v1160_v16, %v1134_v34  ;;  %v729_v1 = vsel %vm644_vm4, %v2363_v0, %v727_v40  ;;  %v1596_v25 = vrot.slane %v4463_v53, 1  ;;  %v2502_v45 = vrot.slane %v4464_v52, 4 }
 0x33c   :  { %1178 = vst.msk [vmem:[%s4388_s1 + $0x38] sm:$0xff] %vm1170_vm10, %v1169_v8  ;;  %v731_v29 = vsel %vm646_vm5, %v2960_v41, %v729_v1  ;;  %v2503_v61 = vrot.slane %v4465_v54, 3  ;;  %v1764_v27 = vrot.slane %v4461_v51, 7  ;;  %v2518_v36 = vrot.slane %v3364_v59, 9 }
 0x33d   :  { %v733_v12 = vsel %vm648_vm6, %v2365_v14, %v731_v29  ;;  %v1842_v22 = vsel %vm65_vm0, %v2516_v15, %v1664_v47  ;;  %v1847_v8 = vrot.slane %v1680_v17, 4  ;;  %v1811_v4 = vrot.slane %v1596_v25, 1 }
 0x33e   :  { %v1150_v5 = vsel %vm1143_vm7, %v733_v12, %v3896_v30  ;;  %v1844_v16 = vsel %vm68_vm1, %v2517_v42, %v1842_v22  ;;  %v1883_v48 = vrot.slane %v1764_v27, 7  ;;  %v1760_v55 = vrot.slane %v3341_v39, 7 }
 0x33f   :  { %v1120_v35 = vpop.permute.xlu0 %1119  ;;  %v1159_v26 = vsel %vm1152_vm8, %v1150_v5, %v4024_v23  ;;  %v2500_v23 = vrot.slane %v3364_v59, 6  ;;  %v1846_v43 = vsel %vm71_vm2, %v2518_v36, %v1844_v16  ;;  %v2504_v46 = vrot.slane %v4461_v51, 9 }
 0x340   :  { %v1162_v56 = vsel %vm1161_vm9, %v1153_v2, %v1120_v35  ;;  %v2534_v2 = vrot.slane %v3382_v32, 13  ;;  %v1848_v35 = vsel %vm642_vm3, %v1847_v8, %v1846_v43  ;;  %v1600_v0 = vrot.slane %v3341_v39, 2 }
 0x341   :  { %1171 = vst.msk [vmem:[%s4388_s1] sm:$0xff] %vm1170_vm10, %v1162_v56  ;;  %v1804_v62 = vsel %vm71_vm2, %v2500_v23, %v1802_v18  ;;  %v2519_v56 = vrot.slane %v4464_v52, 7  ;;  %v1884_v14 = vsel %vm65_vm0, %v1883_v48, %v1760_v55  ;;  %v1736_v12 = vrot.slane %v3382_v32, 6 }
 0x342   :  { %v2013_v57 = vpop.permute.xlu2 %2012  ;;  %v1806_v60 = vsel %vm642_vm3, %v2501_v21, %v1804_v62  ;;  %v1886_v5 = vsel %vm68_vm1, %v2534_v2, %v1884_v14  ;;  %v2506_v6 = vrot.slane %v3364_v59, 7  ;;  %v1814_v49 = vsel %vm65_vm0, %v2504_v46, %v1600_v0 }
 0x343   :  { %v1808_v28 = vsel %vm644_vm4, %v2502_v45, %v1806_v60  ;;  %v1816_v18 = vsel %vm68_vm1, %v3382_v32, %v1814_v49  ;;  %v2507_v21 = vrot.slane %v4462_v7, 6  ;;  %v1792_v15 = vsel %vm65_vm0, %v1764_v27, %v3341_v39 }
 0x344   :  { %v1810_v37 = vsel %vm646_vm5, %v2503_v61, %v1808_v28  ;;  %v2522_v62 = vrot.slane %v4461_v51, 12  ;;  %v1696_v42 = vrot.slane %v3341_v39, 5  ;;  %v1793_v60 = vsel %vm68_vm1, %v1736_v12, %v1792_v15 }
 0x345   :  { %v1812_v33 = vsel %vm648_vm6, %v1811_v4, %v1810_v37  ;;  %v1708_v61 = vrot.slane %v3364_v59, 5  ;;  %v1624_v36 = vrot.slane %v4465_v54, 2  ;;  %v2537_v27 = vrot.slane %v4464_v52, 10 }
 0x346   :  { %v2293_v40 = vsel %vm1143_vm7, %v1812_v33, %v2013_v57  ;;  %v2521_v57 = vrot.slane %v4463_v53, 5  ;;  %v2523_v16 = vrot.slane %v3382_v32, 11  ;;  %v1818_v8 = vsel %vm71_vm2, %v2506_v6, %v1816_v18 }
 0x347   :  { %v1126_v44 = vpop.permute.xlu0 %1125  ;;  %v2538_v37 = vrot.slane %v4465_v54, 9  ;;  %v1794_v48 = vsel %vm71_vm2, %v1708_v61, %v1793_v60  ;;  %v2508_v33 = vrot.slane %v4464_v52, 5  ;;  %v1856_v46 = vsel %vm65_vm0, %v2522_v62, %v1696_v42 }
 0x348   :  { %v1165_v19 = vsel %vm1161_vm9, %v1156_v63, %v1126_v44  ;;  %v2520_v63 = vrot.slane %v4465_v54, 6  ;;  %v2535_v44 = vrot.slane %v3364_v59, 12  ;;  %v1859_v0 = vrot.slane %v1708_v61, 5 }
 0x349   :  { %1174 = vst.msk [vmem:[%s4388_s1 + $0x18] sm:$0xff] %vm1170_vm10, %v1165_v19  ;;  %v1850_v19 = vsel %vm644_vm4, %v2519_v56, %v1848_v35  ;;  %v1632_v35 = vrot.slane %v3341_v39, 3  ;;  %v1795_v56 = vsel %vm642_vm3, %v1680_v17, %v1794_v48  ;;  %v2513_v18 = vrot.slane %v4462_v7, 7 }
 0x34a   :  { %v4167_v3 = vpop.permute.xlu2 %2020  ;;  %v1852_v23 = vsel %vm646_vm5, %v2520_v63, %v1850_v19  ;;  %v1888_v47 = vsel %vm71_vm2, %v2535_v44, %v1886_v5  ;;  %v1652_v63 = vrot.slane %v4464_v52, 3  ;;  %v2511_v44 = vrot.slane %v3382_v32, 9 }
 0x34b   :  { %v1854_v28 = vsel %vm648_vm6, %v2521_v57, %v1852_v23  ;;  %v1858_v19 = vsel %vm68_vm1, %v2523_v16, %v1856_v46  ;;  %v1728_v60 = vrot.slane %v3341_v39, 6 }
 0x34c   :  { %v4171_v24 = vpop.permute.xlu1 %2014  ;;  %v1796_v5 = vsel %vm644_vm4, %v1652_v63, %v1795_v56 }
 0x34f   :  { %v1132_v10 = vpop.permute.xlu0 %1131 }
 0x350   :  { %v1168_v38 = vsel %vm1161_vm9, %v1159_v26, %v1132_v10  ;;  %v2536_v26 = vrot.slane %v4462_v7, 11 }
 0x351   :  { %1177 = vst.msk [vmem:[%s4388_s1 + $0x30] sm:$0xff] %vm1170_vm10, %v1168_v38  ;;  %v2510_v38 = vrot.slane %v4461_v51, 10 }
 0x352   :  { %v4183_v11 = vpop.permute.xlu2 %2139  ;;  %v1890_v45 = vsel %vm642_vm3, %v2536_v26, %v1888_v47  ;;  %v2509_v26 = vrot.slane %v4463_v53, 3  ;;  %v2528_v47 = vrot.slane %v4461_v51, 13 }
 0x353   :  { %v1892_v55 = vsel %vm644_vm4, %v2537_v27, %v1890_v45  ;;  %v1828_v6 = vsel %vm65_vm0, %v2510_v38, %v1632_v35  ;;  %v1871_v45 = vrot.slane %v1736_v12, 6 }
 0x354   :  { %v4185_v41 = vpop.permute.xlu1 %2016  ;;  %v1894_v17 = vsel %vm646_vm5, %v2538_v37, %v1892_v55  ;;  %v2527_v37 = vrot.slane %v4463_v53, 6 }
 0x355   :  { %v1896_v49 = vsel %vm648_vm6, %v4463_v53, %v1894_v17 }
 0x357   :  { %v4189_v30 = vpop.permute.xlu0 %2010 }
 0x35c   :  { %v4194_v58 = vpop.permute.xlu2 %2145 }
 0x35f   :  { %v4198_v31 = vpop.permute.xlu1 %2022  ;;  %v2019_v9 = vpop.permute.xlu0 %2018 }
 0x360   :  { %v2296_v4 = vsel %vm1143_vm7, %v1854_v28, %v2019_v9 }
 0x366   :  { %v4213_v34 = vpop.permute.xlu2 %2151 }
 0x367   :  { %v2142_v13 = vpop.permute.xlu1 %2141  ;;  %v4227_v20 = vpop.permute.xlu0 %2024 }
 0x368   :  { %v2301_v1 = vsel %vm1152_vm8, %v2293_v40, %v2142_v13  ;;  %v1820_v13 = vsel %vm642_vm3, %v2507_v21, %v1818_v8  ;;  %v1823_v40 = vrot.slane %v1624_v36, 2  ;;  %v1797_v21 = vsel %vm646_vm5, %v1624_v36, %v1796_v5 }
 0x369   :  { %v2299_v15 = vsel %vm1143_vm7, %v1896_v49, %v4227_v20  ;;  %v2526_v36 = vrot.slane %v4465_v54, 7  ;;  %v1798_v27 = vsel %vm648_vm6, %v1596_v25, %v1797_v21  ;;  %v1835_v8 = vrot.slane %v1652_v63, 3 }
 0x36a   :  { %v2529_v25 = vrot.slane %v3364_v59, 11 }
 0x36e   :  { %v2271_v29 = vpop.permute.xlu2 %2270 }
 0x36f   :  { %v2309_v10 = vsel %vm1161_vm9, %v2301_v1, %v2271_v29  ;;  %v2148_v50 = vpop.permute.xlu1 %2147  ;;  %v1822_v1 = vsel %vm644_vm4, %v2508_v33, %v1820_v13  ;;  %v2524_v29 = vrot.slane %v4462_v7, 9  ;;  %v2514_v13 = vrot.slane %v4465_v54, 5 }
 0x370   :  { %2667 = vst.msk [vmem:[%s4388_s1 + $0x48] sm:$0xff] %vm1170_vm10, %v2309_v10  ;;  %v2304_v43 = vsel %vm1152_vm8, %v2296_v4, %v2148_v50  ;;  %v1860_v10 = vsel %vm71_vm2, %v1859_v0, %v1858_v19  ;;  %v1824_v57 = vsel %vm646_vm5, %v1823_v40, %v1822_v1  ;;  %v1830_v50 = vsel %vm68_vm1, %v2511_v44, %v1828_v6 }
 0x371   :  { %v1862_v62 = vsel %vm642_vm3, %v2524_v29, %v1860_v10  ;;  %v1826_v61 = vsel %vm648_vm6, %v2509_v26, %v1824_v57  ;;  %v1832_v51 = vsel %vm71_vm2, %v3364_v59, %v1830_v50  ;;  %v2515_v33 = vrot.slane %v4463_v53, 4 }
 0x372   :  { %v2294_v20 = vsel %vm1143_vm7, %v1826_v61, %v4171_v24  ;;  %v1864_v39 = vsel %vm644_vm4, %v4464_v52, %v1862_v62  ;;  %v1834_v32 = vsel %vm642_vm3, %v2513_v18, %v1832_v51  ;;  %v2292_v24 = vsel %vm1143_vm7, %v1798_v27, %v4189_v30 }
 0x373   :  { %v2144_v22 = vpop.permute.xlu0 %2143  ;;  %v1866_v48 = vsel %vm646_vm5, %v2526_v36, %v1864_v39  ;;  %v1836_v30 = vsel %vm644_vm4, %v1835_v8, %v1834_v32  ;;  %v2300_v55 = vsel %vm1152_vm8, %v2292_v24, %v4183_v11  ;;  %v2531_v44 = vrot.slane %v4464_v52, 9 }
 0x374   :  { %v2302_v12 = vsel %vm1152_vm8, %v2294_v20, %v2144_v22  ;;  %v1870_v22 = vsel %vm65_vm0, %v2528_v47, %v1728_v60  ;;  %v1868_v56 = vsel %vm648_vm6, %v2527_v37, %v1866_v48  ;;  %v2533_v52 = vrot.slane %v4463_v53, 7 }
 0x375   :  { %v1872_v59 = vsel %vm68_vm1, %v1871_v45, %v1870_v22  ;;  %v2297_v11 = vsel %vm1143_vm7, %v1868_v56, %v4167_v3 }
 0x376   :  { %v2277_v2 = vpop.permute.xlu2 %2276  ;;  %v1874_v46 = vsel %vm71_vm2, %v2529_v25, %v1872_v59 }
 0x377   :  { %v2312_v9 = vsel %vm1161_vm9, %v2304_v43, %v2277_v2  ;;  %v2154_v14 = vpop.permute.xlu1 %2153  ;;  %v2530_v2 = vrot.slane %v4462_v7, 10 }
 0x378   :  { %2670 = vst.msk [vmem:[%s4388_s1 + $0x60] sm:$0xff] %vm1170_vm10, %v2312_v9  ;;  %v2307_v42 = vsel %vm1152_vm8, %v2299_v15, %v2154_v14  ;;  %v1838_v9 = vsel %vm646_vm5, %v2514_v13, %v1836_v30 }
 0x379   :  { %v1876_v7 = vsel %vm642_vm3, %v2530_v2, %v1874_v46  ;;  %v1840_v63 = vsel %vm648_vm6, %v2515_v33, %v1838_v9 }
 0x37a   :  { %v2295_v1 = vsel %vm1143_vm7, %v1840_v63, %v4185_v41  ;;  %v1878_v17 = vsel %vm644_vm4, %v2531_v44, %v1876_v7 }
 0x37b   :  { %v2303_v3 = vsel %vm1152_vm8, %v2295_v1, %v4194_v58  ;;  %v1880_v41 = vsel %vm646_vm5, %v4465_v54, %v1878_v17 }
 0x37c   :  { %v2150_v23 = vpop.permute.xlu0 %2149  ;;  %v1882_v5 = vsel %vm648_vm6, %v2533_v52, %v1880_v41 }
 0x37d   :  { %v2305_v0 = vsel %vm1152_vm8, %v2297_v11, %v2150_v23  ;;  %v2298_v58 = vsel %vm1143_vm7, %v1882_v5, %v4198_v31 }
 0x37e   :  { %v2283_v38 = vpop.permute.xlu2 %2282  ;;  %v2306_v26 = vsel %vm1152_vm8, %v2298_v58, %v4213_v34 }
 0x37f   :  { %v2315_v28 = vsel %vm1161_vm9, %v2307_v42, %v2283_v38  ;;  %v2273_v16 = vpop.permute.xlu1 %2272 }
 0x380   :  { %2673 = vst.msk [vmem:[%s4388_s1 + $0x78] sm:$0xff] %vm1170_vm10, %v2315_v28  ;;  %v2310_v4 = vsel %vm1161_vm9, %v2302_v12, %v2273_v16 }
 0x381   :  { %2668 = vst.msk [vmem:[%s4388_s1 + $0x50] sm:$0xff] %vm1170_vm10, %v2310_v4 }
 0x384   :  { %v2269_v43 = vpop.permute.xlu0 %2268 }
 0x385   :  { %v2308_v35 = vsel %vm1161_vm9, %v2300_v55, %v2269_v43 }
 0x386   :  { %2666 = vst.msk [vmem:[%s4388_s1 + $0x40] sm:$0xff] %vm1170_vm10, %v2308_v35 }
 0x389   :  { %v2279_v40 = vpop.permute.xlu1 %2278 }
 0x38a   :  { %v2313_v19 = vsel %vm1161_vm9, %v2305_v0, %v2279_v40 }
 0x38b   :  { %2671 = vst.msk [vmem:[%s4388_s1 + $0x68] sm:$0xff] %vm1170_vm10, %v2313_v19 }
 0x38c   :  { %v2275_v14 = vpop.permute.xlu0 %2274 }
 0x38d   :  { %v2311_v29 = vsel %vm1161_vm9, %v2303_v3, %v2275_v14 }
 0x38e   :  { %2669 = vst.msk [vmem:[%s4388_s1 + $0x58] sm:$0xff] %vm1170_vm10, %v2311_v29 }
 0x394   :  { %v2281_v10 = vpop.permute.xlu0 %2280 }
 0x395   :  { %v2314_v57 = vsel %vm1161_vm9, %v2306_v26, %v2281_v10 }
 0x396   :  { %2672 = vst.msk [vmem:[%s4388_s1 + $0x70] sm:$0xff] %vm1170_vm10, %v2314_v57 }
 0x397   :  { %2329 = vsyncpa [#allocation3], 1 }

</bundles_post_ra>
